<compile_context>
chip_gen: v6e
topology: v6e:2x2x1
jax: 0.10.0
libtpu: 0.0.40
codegen_flags: <defaults>
</compile_context>

<pallas_src>
import functools

import jax
import jax.numpy as jnp
from jax.experimental import pallas as pl
from jax.experimental.pallas import tpu as pltpu


# ----------------------------- Kernel helpers ------------------------------ #

def _lstm_cell(gates, c_prev, H):
    """gates: (B, 4H) pre-activations, PyTorch gate order (i, f, g, o)."""
    s = jax.nn.sigmoid(gates)                 # one full-width EUP pass (i, f, o)
    g = jnp.tanh(gates[:, 2 * H:3 * H])       # candidate
    c = s[:, H:2 * H] * c_prev + s[:, 0:H] * g
    h = s[:, 3 * H:4 * H] * jnp.tanh(c)
    return h, c


def _run_bidir_layer(pre_f, pre_b, w_hh_f, w_hh_b, scr_f, scr_b, *, T, B, H):
    """One bidirectional LSTM layer; fwd and bwd fused in one unrolled loop.

    pre_f / pre_b : (T*B, 4H) hoisted input pre-activations (bias folded in)
    w_hh_*        : (H, 4H)
    scr_f / scr_b : VMEM refs (T*B, H) to receive per-time hidden states, or None
    Returns (h_fwd at t=T-1, h_bwd at t=T-1)  -- i.e. out[:, -1, :] halves.
    """
    zeros = jnp.zeros((B, H), jnp.float32)
    hf, cf, hb, cb = zeros, zeros, zeros, zeros
    hb_last = zeros
    for t in range(T):                         # fully unrolled static time loop
        tb = T - 1 - t                         # backward-direction time index
        gf = pre_f[t * B:(t + 1) * B, :] + jnp.dot(
            hf, w_hh_f, preferred_element_type=jnp.float32)
        gb = pre_b[tb * B:(tb + 1) * B, :] + jnp.dot(
            hb, w_hh_b, preferred_element_type=jnp.float32)
        hf, cf = _lstm_cell(gf, cf, H)
        hb, cb = _lstm_cell(gb, cb, H)
        if scr_f is not None:
            scr_f[t * B:(t + 1) * B, :] = hf       # 8-row aligned slab stores
            scr_b[tb * B:(tb + 1) * B, :] = hb
        if t == 0:
            hb_last = hb                       # bwd hidden at time index T-1
    return hf, hb_last


def _text_rnn_kernel(x_ref,
                     w_ih_0f, w_hh_0f, b_0f, w_ih_0b, w_hh_0b, b_0b,
                     w_ih_1f_lo, w_ih_1f_hi, w_hh_1f, b_1f,
                     w_ih_1b_lo, w_ih_1b_hi, w_hh_1b, b_1b,
                     fc_w_f, fc_w_b, fc_b,
                     o_ref, scr_f, scr_b, *, T, B, H):
    """Fused forward: 2 bidirectional LSTM layers + final FC.

    x_ref          : (T*B, E)  f32 time-major flattened embeddings
    scr_f / scr_b  : (T*B, H)  f32 VMEM scratch (layer-0 sequence outputs)
    o_ref          : (B, C)    f32 logits
    """
    x = x_ref[...]

    # ---- layer 0: hoisted input projection, then the serial recurrence ----
    pre_0f = jnp.dot(x, w_ih_0f[...], preferred_element_type=jnp.float32) + b_0f[...]
    pre_0b = jnp.dot(x, w_ih_0b[...], preferred_element_type=jnp.float32) + b_0b[...]
    _run_bidir_layer(pre_0f, pre_0b, w_hh_0f[...], w_hh_0b[...],
                     scr_f, scr_b, T=T, B=B, H=H)

    # ---- layer 1: input = [seq_f | seq_b]; concat folded into two matmuls ----
    s_f = scr_f[...]
    s_b = scr_b[...]
    pre_1f = (jnp.dot(s_f, w_ih_1f_lo[...], preferred_element_type=jnp.float32)
              + jnp.dot(s_b, w_ih_1f_hi[...], preferred_element_type=jnp.float32)
              + b_1f[...])
    pre_1b = (jnp.dot(s_f, w_ih_1b_lo[...], preferred_element_type=jnp.float32)
              + jnp.dot(s_b, w_ih_1b_hi[...], preferred_element_type=jnp.float32)
              + b_1b[...])
    h_f, h_b = _run_bidir_layer(pre_1f, pre_1b, w_hh_1f[...], w_hh_1b[...],
                                None, None, T=T, B=B, H=H)

    # ---- FC on out[:, -1, :] == [h_fwd(T-1) | h_bwd(T-1)] (concat folded) ----
    o_ref[...] = (jnp.dot(h_f, fc_w_f[...], preferred_element_type=jnp.float32)
                  + jnp.dot(h_b, fc_w_b[...], preferred_element_type=jnp.float32)
                  + fc_b[...])


# ------------------------------- Wrapper ----------------------------------- #

@jax.jit
def text_rnn_forward(tokens, params):
    """tokens: (B, T) int32 -> logits (B, num_classes).

    Mirrors Model.forward (eval mode):
        out = embedding(x); out, _ = lstm(out); out = fc(out[:, -1, :])
    """
    # Embedding lookup (data-dependent gather) stays in plain-JAX glue.
    emb = jnp.take(params["embedding"], tokens, axis=0)        # (B, T, E)
    B, T, E = emb.shape

    # time-major; pad batch to a multiple of 8 so in-kernel row slabs are
    # sublane-aligned, then flatten to (T*Bp, E) for one 2-D input projection.
    Bp = ((B + 7) // 8) * 8
    x = jnp.transpose(emb, (1, 0, 2)).astype(jnp.float32)      # (T, B, E)
    if Bp != B:
        x = jnp.pad(x, ((0, 0), (0, Bp - B), (0, 0)))
    x = x.reshape(T * Bp, E)

    l0, l1 = params["lstm"]
    H = l0["w_hh_f"].shape[0]
    C = params["fc_w"].shape[1]
    # TODO(synk): inter-layer dropout (p=0.5) skipped — eval-mode forward.

    # Pre-split layer-1 input weights and fc weight along their input dim so
    # the kernel never has to row-concatenate fwd/bwd halves.
    w_ih_1f_lo, w_ih_1f_hi = l1["w_ih_f"][:H], l1["w_ih_f"][H:]
    w_ih_1b_lo, w_ih_1b_hi = l1["w_ih_b"][:H], l1["w_ih_b"][H:]
    fc_w_f, fc_w_b = params["fc_w"][:H], params["fc_w"][H:]

    kernel = functools.partial(_text_rnn_kernel, T=T, B=Bp, H=H)
    out = pl.pallas_call(
        kernel,
        out_shape=jax.ShapeDtypeStruct((Bp, C), jnp.float32),
        in_specs=[pl.BlockSpec(memory_space=pltpu.MemorySpace.VMEM)] * 18,
        out_specs=pl.BlockSpec(memory_space=pltpu.MemorySpace.VMEM),
        scratch_shapes=[pltpu.VMEM((T * Bp, H), jnp.float32),
                        pltpu.VMEM((T * Bp, H), jnp.float32)],
    )(x,
      l0["w_ih_f"], l0["w_hh_f"], l0["b_f"],
      l0["w_ih_b"], l0["w_hh_b"], l0["b_b"],
      w_ih_1f_lo, w_ih_1f_hi, l1["w_hh_f"], l1["b_f"],
      w_ih_1b_lo, w_ih_1b_hi, l1["w_hh_b"], l1["b_b"],
      fc_w_f, fc_w_b, params["fc_b"])
    return out[:B]


# --------------------------- Deterministic params --------------------------- #

def init_params(key, n_vocab, embed, hidden, num_layers, num_classes):
    params = {"lstm": []}
    key, ke = jax.random.split(key)
    params["embedding"] = (0.1 * jax.random.normal(
        ke, (n_vocab, embed))).astype(jnp.float32)

    scale = 1.0 / jnp.sqrt(hidden)
    in_dim = embed
    for _ in range(num_layers):
        layer = {}
        for d in ("f", "b"):
            key, k1, k2, k3, k4 = jax.random.split(key, 5)
            # stored already transposed: (Din, 4H) / (H, 4H); gate order i,f,g,o
            layer[f"w_ih_{d}"] = jax.random.uniform(
                k1, (in_dim, 4 * hidden), jnp.float32, -scale, scale)
            layer[f"w_hh_{d}"] = jax.random.uniform(
                k2, (hidden, 4 * hidden), jnp.float32, -scale, scale)
            b_ih = jax.random.uniform(k3, (4 * hidden,), jnp.float32, -scale, scale)
            b_hh = jax.random.uniform(k4, (4 * hidden,), jnp.float32, -scale, scale)
            layer[f"b_{d}"] = (b_ih + b_hh).reshape(1, 4 * hidden)
        params["lstm"].append(layer)
        in_dim = 2 * hidden  # next layer consumes bidirectional output

    key, kw, kb = jax.random.split(key, 3)
    fscale = 1.0 / jnp.sqrt(2 * hidden)
    params["fc_w"] = jax.random.uniform(
        kw, (2 * hidden, num_classes), jnp.float32, -fscale, fscale)
    params["fc_b"] = jax.random.uniform(
        kb, (1, num_classes), jnp.float32, -fscale, fscale)
    return params


# ---------------------------------- Main ------------------------------------ #

if __name__ == "__main__":
    # Small shapes consistent with the module's forward pass.
    B, T = 2, 8          # batch, seq (pad_size, scaled down)
    EMBED = 32           # config.embed
    HIDDEN = 32          # hidden_size (scaled down from 128)
    NUM_LAYERS = 2
    NUM_CLASSES = 4
    N_VOCAB = 50

    key = jax.random.PRNGKey(0)
    key, kp, kt = jax.random.split(key, 3)
    params = init_params(kp, N_VOCAB, EMBED, HIDDEN, NUM_LAYERS, NUM_CLASSES)
    tokens = jax.random.randint(kt, (B, T), 0, N_VOCAB, dtype=jnp.int32)

    logits = text_rnn_forward(tokens, params)
    jax.block_until_ready(logits)
    assert logits.shape == (B, NUM_CLASSES)
    assert bool(jnp.all(jnp.isfinite(logits)))
    print("KERNEL_OK")
</pallas_src>

<mosaic_0001>
module attributes {stable_mosaic.version = 11 : i64} {
  func.func @_text_rnn_kernel(%arg0: memref<64x32xf32, #tpu.memory_space<vmem>>, %arg1: memref<32x128xf32, #tpu.memory_space<vmem>>, %arg2: memref<32x128xf32, #tpu.memory_space<vmem>>, %arg3: memref<1x128xf32, #tpu.memory_space<vmem>>, %arg4: memref<32x128xf32, #tpu.memory_space<vmem>>, %arg5: memref<32x128xf32, #tpu.memory_space<vmem>>, %arg6: memref<1x128xf32, #tpu.memory_space<vmem>>, %arg7: memref<32x128xf32, #tpu.memory_space<vmem>>, %arg8: memref<32x128xf32, #tpu.memory_space<vmem>>, %arg9: memref<32x128xf32, #tpu.memory_space<vmem>>, %arg10: memref<1x128xf32, #tpu.memory_space<vmem>>, %arg11: memref<32x128xf32, #tpu.memory_space<vmem>>, %arg12: memref<32x128xf32, #tpu.memory_space<vmem>>, %arg13: memref<32x128xf32, #tpu.memory_space<vmem>>, %arg14: memref<1x128xf32, #tpu.memory_space<vmem>>, %arg15: memref<32x4xf32, #tpu.memory_space<vmem>>, %arg16: memref<32x4xf32, #tpu.memory_space<vmem>>, %arg17: memref<1x4xf32, #tpu.memory_space<vmem>>, %arg18: memref<8x4xf32, #tpu.memory_space<vmem>>, %arg19: memref<64x32xf32, #tpu.memory_space<vmem>>, %arg20: memref<64x32xf32, #tpu.memory_space<vmem>>) attributes {dimension_semantics = [], scalar_prefetch = 0 : i64, scratch_operands = 2 : i64, tpu.core_type = #tpu.core_type<tc>} {
    %c0 = arith.constant 0 : index
    %c0_0 = arith.constant 0 : index
    %0 = vector.load %arg0[%c0, %c0_0] : memref<64x32xf32, #tpu.memory_space<vmem>>, vector<64x32xf32>
    %c0_1 = arith.constant 0 : index
    %c0_2 = arith.constant 0 : index
    %1 = vector.load %arg1[%c0_1, %c0_2] : memref<32x128xf32, #tpu.memory_space<vmem>>, vector<32x128xf32>
    %cst = arith.constant dense<0.000000e+00> : vector<64x128xf32>
    %2 = tpu.matmul %0, %1, %cst {dimension_numbers = #tpu.dot_dimension_numbers<[1], [0], [0], [1], [0, 0, 1, 1], [], []>} : vector<64x32xf32>, vector<32x128xf32>, vector<64x128xf32> -> vector<64x128xf32>
    %c0_3 = arith.constant 0 : index
    %c0_4 = arith.constant 0 : index
    %3 = vector.load %arg3[%c0_3, %c0_4] : memref<1x128xf32, #tpu.memory_space<vmem>>, vector<1x128xf32>
    %4 = vector.broadcast %3 : vector<1x128xf32> to vector<64x128xf32>
    %5 = arith.addf %2, %4 : vector<64x128xf32>
    %c0_5 = arith.constant 0 : index
    %c0_6 = arith.constant 0 : index
    %6 = vector.load %arg4[%c0_5, %c0_6] : memref<32x128xf32, #tpu.memory_space<vmem>>, vector<32x128xf32>
    %cst_7 = arith.constant dense<0.000000e+00> : vector<64x128xf32>
    %7 = tpu.matmul %0, %6, %cst_7 {dimension_numbers = #tpu.dot_dimension_numbers<[1], [0], [0], [1], [0, 0, 1, 1], [], []>} : vector<64x32xf32>, vector<32x128xf32>, vector<64x128xf32> -> vector<64x128xf32>
    %c0_8 = arith.constant 0 : index
    %c0_9 = arith.constant 0 : index
    %8 = vector.load %arg6[%c0_8, %c0_9] : memref<1x128xf32, #tpu.memory_space<vmem>>, vector<1x128xf32>
    %9 = vector.broadcast %8 : vector<1x128xf32> to vector<64x128xf32>
    %10 = arith.addf %7, %9 : vector<64x128xf32>
    %c0_10 = arith.constant 0 : index
    %c0_11 = arith.constant 0 : index
    %11 = vector.load %arg2[%c0_10, %c0_11] : memref<32x128xf32, #tpu.memory_space<vmem>>, vector<32x128xf32>
    %c0_12 = arith.constant 0 : index
    %c0_13 = arith.constant 0 : index
    %12 = vector.load %arg5[%c0_12, %c0_13] : memref<32x128xf32, #tpu.memory_space<vmem>>, vector<32x128xf32>
    %cst_14 = arith.constant 0.000000e+00 : f32
    %13 = vector.broadcast %cst_14 : f32 to vector<8x32xf32>
    %14 = vector.extract_strided_slice %5 {offsets = [0, 0], sizes = [8, 128], strides = [1, 1]} : vector<64x128xf32> to vector<8x128xf32>
    %cst_15 = arith.constant dense<0.000000e+00> : vector<8x128xf32>
    %15 = tpu.matmul %13, %11, %cst_15 {dimension_numbers = #tpu.dot_dimension_numbers<[1], [0], [0], [1], [0, 0, 1, 1], [], []>} : vector<8x32xf32>, vector<32x128xf32>, vector<8x128xf32> -> vector<8x128xf32>
    %16 = arith.addf %14, %15 : vector<8x128xf32>
    %17 = vector.extract_strided_slice %10 {offsets = [56, 0], sizes = [8, 128], strides = [1, 1]} : vector<64x128xf32> to vector<8x128xf32>
    %cst_16 = arith.constant dense<0.000000e+00> : vector<8x128xf32>
    %18 = tpu.matmul %13, %12, %cst_16 {dimension_numbers = #tpu.dot_dimension_numbers<[1], [0], [0], [1], [0, 0, 1, 1], [], []>} : vector<8x32xf32>, vector<32x128xf32>, vector<8x128xf32> -> vector<8x128xf32>
    %19 = arith.addf %17, %18 : vector<8x128xf32>
    %20 = arith.negf %16 : vector<8x128xf32>
    %21 = math.exp %20 : vector<8x128xf32>
    %cst_17 = arith.constant 1.000000e+00 : f32
    %22 = vector.broadcast %cst_17 : f32 to vector<8x128xf32>
    %23 = arith.addf %22, %21 : vector<8x128xf32>
    %24 = arith.divf %22, %23 : vector<8x128xf32>
    %25 = vector.extract_strided_slice %16 {offsets = [0, 64], sizes = [8, 32], strides = [1, 1]} : vector<8x128xf32> to vector<8x32xf32>
    %26 = math.tanh %25 : vector<8x32xf32>
    %27 = vector.extract_strided_slice %24 {offsets = [0, 32], sizes = [8, 32], strides = [1, 1]} : vector<8x128xf32> to vector<8x32xf32>
    %28 = arith.mulf %27, %13 : vector<8x32xf32>
    %29 = vector.extract_strided_slice %24 {offsets = [0, 0], sizes = [8, 32], strides = [1, 1]} : vector<8x128xf32> to vector<8x32xf32>
    %30 = arith.mulf %29, %26 : vector<8x32xf32>
    %31 = arith.addf %28, %30 : vector<8x32xf32>
    %32 = vector.extract_strided_slice %24 {offsets = [0, 96], sizes = [8, 32], strides = [1, 1]} : vector<8x128xf32> to vector<8x32xf32>
    %33 = math.tanh %31 : vector<8x32xf32>
    %34 = arith.mulf %32, %33 : vector<8x32xf32>
    %35 = arith.negf %19 : vector<8x128xf32>
    %36 = math.exp %35 : vector<8x128xf32>
    %cst_18 = arith.constant 1.000000e+00 : f32
    %37 = vector.broadcast %cst_18 : f32 to vector<8x128xf32>
    %38 = arith.addf %37, %36 : vector<8x128xf32>
    %39 = arith.divf %37, %38 : vector<8x128xf32>
    %40 = vector.extract_strided_slice %19 {offsets = [0, 64], sizes = [8, 32], strides = [1, 1]} : vector<8x128xf32> to vector<8x32xf32>
    %41 = math.tanh %40 : vector<8x32xf32>
    %42 = vector.extract_strided_slice %39 {offsets = [0, 32], sizes = [8, 32], strides = [1, 1]} : vector<8x128xf32> to vector<8x32xf32>
    %43 = arith.mulf %42, %13 : vector<8x32xf32>
    %44 = vector.extract_strided_slice %39 {offsets = [0, 0], sizes = [8, 32], strides = [1, 1]} : vector<8x128xf32> to vector<8x32xf32>
    %45 = arith.mulf %44, %41 : vector<8x32xf32>
    %46 = arith.addf %43, %45 : vector<8x32xf32>
    %47 = vector.extract_strided_slice %39 {offsets = [0, 96], sizes = [8, 32], strides = [1, 1]} : vector<8x128xf32> to vector<8x32xf32>
    %48 = math.tanh %46 : vector<8x32xf32>
    %49 = arith.mulf %47, %48 : vector<8x32xf32>
    %c0_19 = arith.constant 0 : index
    %c0_20 = arith.constant 0 : index
    %50 = vector.load %arg19[%c0_19, %c0_20] : memref<64x32xf32, #tpu.memory_space<vmem>>, vector<8x32xf32>
    tpu.vector_store %arg19[%c0_19, %c0_20], %34 {strides = array<i32>} : memref<64x32xf32, #tpu.memory_space<vmem>>, vector<8x32xf32>,
    %c56 = arith.constant 56 : index
    %c0_21 = arith.constant 0 : index
    %51 = vector.load %arg20[%c56, %c0_21] : memref<64x32xf32, #tpu.memory_space<vmem>>, vector<8x32xf32>
    tpu.vector_store %arg20[%c56, %c0_21], %49 {strides = array<i32>} : memref<64x32xf32, #tpu.memory_space<vmem>>, vector<8x32xf32>,
    %52 = vector.extract_strided_slice %5 {offsets = [8, 0], sizes = [8, 128], strides = [1, 1]} : vector<64x128xf32> to vector<8x128xf32>
    %cst_22 = arith.constant dense<0.000000e+00> : vector<8x128xf32>
    %53 = tpu.matmul %34, %11, %cst_22 {dimension_numbers = #tpu.dot_dimension_numbers<[1], [0], [0], [1], [0, 0, 1, 1], [], []>} : vector<8x32xf32>, vector<32x128xf32>, vector<8x128xf32> -> vector<8x128xf32>
    %54 = arith.addf %52, %53 : vector<8x128xf32>
    %55 = vector.extract_strided_slice %10 {offsets = [48, 0], sizes = [8, 128], strides = [1, 1]} : vector<64x128xf32> to vector<8x128xf32>
    %cst_23 = arith.constant dense<0.000000e+00> : vector<8x128xf32>
    %56 = tpu.matmul %49, %12, %cst_23 {dimension_numbers = #tpu.dot_dimension_numbers<[1], [0], [0], [1], [0, 0, 1, 1], [], []>} : vector<8x32xf32>, vector<32x128xf32>, vector<8x128xf32> -> vector<8x128xf32>
    %57 = arith.addf %55, %56 : vector<8x128xf32>
    %58 = arith.negf %54 : vector<8x128xf32>
    %59 = math.exp %58 : vector<8x128xf32>
    %cst_24 = arith.constant 1.000000e+00 : f32
    %60 = vector.broadcast %cst_24 : f32 to vector<8x128xf32>
    %61 = arith.addf %60, %59 : vector<8x128xf32>
    %62 = arith.divf %60, %61 : vector<8x128xf32>
    %63 = vector.extract_strided_slice %54 {offsets = [0, 64], sizes = [8, 32], strides = [1, 1]} : vector<8x128xf32> to vector<8x32xf32>
    %64 = math.tanh %63 : vector<8x32xf32>
    %65 = vector.extract_strided_slice %62 {offsets = [0, 32], sizes = [8, 32], strides = [1, 1]} : vector<8x128xf32> to vector<8x32xf32>
    %66 = arith.mulf %65, %31 : vector<8x32xf32>
    %67 = vector.extract_strided_slice %62 {offsets = [0, 0], sizes = [8, 32], strides = [1, 1]} : vector<8x128xf32> to vector<8x32xf32>
    %68 = arith.mulf %67, %64 : vector<8x32xf32>
    %69 = arith.addf %66, %68 : vector<8x32xf32>
    %70 = vector.extract_strided_slice %62 {offsets = [0, 96], sizes = [8, 32], strides = [1, 1]} : vector<8x128xf32> to vector<8x32xf32>
    %71 = math.tanh %69 : vector<8x32xf32>
    %72 = arith.mulf %70, %71 : vector<8x32xf32>
    %73 = arith.negf %57 : vector<8x128xf32>
    %74 = math.exp %73 : vector<8x128xf32>
    %cst_25 = arith.constant 1.000000e+00 : f32
    %75 = vector.broadcast %cst_25 : f32 to vector<8x128xf32>
    %76 = arith.addf %75, %74 : vector<8x128xf32>
    %77 = arith.divf %75, %76 : vector<8x128xf32>
    %78 = vector.extract_strided_slice %57 {offsets = [0, 64], sizes = [8, 32], strides = [1, 1]} : vector<8x128xf32> to vector<8x32xf32>
    %79 = math.tanh %78 : vector<8x32xf32>
    %80 = vector.extract_strided_slice %77 {offsets = [0, 32], sizes = [8, 32], strides = [1, 1]} : vector<8x128xf32> to vector<8x32xf32>
    %81 = arith.mulf %80, %46 : vector<8x32xf32>
    %82 = vector.extract_strided_slice %77 {offsets = [0, 0], sizes = [8, 32], strides = [1, 1]} : vector<8x128xf32> to vector<8x32xf32>
    %83 = arith.mulf %82, %79 : vector<8x32xf32>
    %84 = arith.addf %81, %83 : vector<8x32xf32>
    %85 = vector.extract_strided_slice %77 {offsets = [0, 96], sizes = [8, 32], strides = [1, 1]} : vector<8x128xf32> to vector<8x32xf32>
    %86 = math.tanh %84 : vector<8x32xf32>
    %87 = arith.mulf %85, %86 : vector<8x32xf32>
    %c8 = arith.constant 8 : index
    %c0_26 = arith.constant 0 : index
    %88 = vector.load %arg19[%c8, %c0_26] : memref<64x32xf32, #tpu.memory_space<vmem>>, vector<8x32xf32>
    tpu.vector_store %arg19[%c8, %c0_26], %72 {strides = array<i32>} : memref<64x32xf32, #tpu.memory_space<vmem>>, vector<8x32xf32>,
    %c48 = arith.constant 48 : index
    %c0_27 = arith.constant 0 : index
    %89 = vector.load %arg20[%c48, %c0_27] : memref<64x32xf32, #tpu.memory_space<vmem>>, vector<8x32xf32>
    tpu.vector_store %arg20[%c48, %c0_27], %87 {strides = array<i32>} : memref<64x32xf32, #tpu.memory_space<vmem>>, vector<8x32xf32>,
    %90 = vector.extract_strided_slice %5 {offsets = [16, 0], sizes = [8, 128], strides = [1, 1]} : vector<64x128xf32> to vector<8x128xf32>
    %cst_28 = arith.constant dense<0.000000e+00> : vector<8x128xf32>
    %91 = tpu.matmul %72, %11, %cst_28 {dimension_numbers = #tpu.dot_dimension_numbers<[1], [0], [0], [1], [0, 0, 1, 1], [], []>} : vector<8x32xf32>, vector<32x128xf32>, vector<8x128xf32> -> vector<8x128xf32>
    %92 = arith.addf %90, %91 : vector<8x128xf32>
    %93 = vector.extract_strided_slice %10 {offsets = [40, 0], sizes = [8, 128], strides = [1, 1]} : vector<64x128xf32> to vector<8x128xf32>
    %cst_29 = arith.constant dense<0.000000e+00> : vector<8x128xf32>
    %94 = tpu.matmul %87, %12, %cst_29 {dimension_numbers = #tpu.dot_dimension_numbers<[1], [0], [0], [1], [0, 0, 1, 1], [], []>} : vector<8x32xf32>, vector<32x128xf32>, vector<8x128xf32> -> vector<8x128xf32>
    %95 = arith.addf %93, %94 : vector<8x128xf32>
    %96 = arith.negf %92 : vector<8x128xf32>
    %97 = math.exp %96 : vector<8x128xf32>
    %cst_30 = arith.constant 1.000000e+00 : f32
    %98 = vector.broadcast %cst_30 : f32 to vector<8x128xf32>
    %99 = arith.addf %98, %97 : vector<8x128xf32>
    %100 = arith.divf %98, %99 : vector<8x128xf32>
    %101 = vector.extract_strided_slice %92 {offsets = [0, 64], sizes = [8, 32], strides = [1, 1]} : vector<8x128xf32> to vector<8x32xf32>
    %102 = math.tanh %101 : vector<8x32xf32>
    %103 = vector.extract_strided_slice %100 {offsets = [0, 32], sizes = [8, 32], strides = [1, 1]} : vector<8x128xf32> to vector<8x32xf32>
    %104 = arith.mulf %103, %69 : vector<8x32xf32>
    %105 = vector.extract_strided_slice %100 {offsets = [0, 0], sizes = [8, 32], strides = [1, 1]} : vector<8x128xf32> to vector<8x32xf32>
    %106 = arith.mulf %105, %102 : vector<8x32xf32>
    %107 = arith.addf %104, %106 : vector<8x32xf32>
    %108 = vector.extract_strided_slice %100 {offsets = [0, 96], sizes = [8, 32], strides = [1, 1]} : vector<8x128xf32> to vector<8x32xf32>
    %109 = math.tanh %107 : vector<8x32xf32>
    %110 = arith.mulf %108, %109 : vector<8x32xf32>
    %111 = arith.negf %95 : vector<8x128xf32>
    %112 = math.exp %111 : vector<8x128xf32>
    %cst_31 = arith.constant 1.000000e+00 : f32
    %113 = vector.broadcast %cst_31 : f32 to vector<8x128xf32>
    %114 = arith.addf %113, %112 : vector<8x128xf32>
    %115 = arith.divf %113, %114 : vector<8x128xf32>
    %116 = vector.extract_strided_slice %95 {offsets = [0, 64], sizes = [8, 32], strides = [1, 1]} : vector<8x128xf32> to vector<8x32xf32>
    %117 = math.tanh %116 : vector<8x32xf32>
    %118 = vector.extract_strided_slice %115 {offsets = [0, 32], sizes = [8, 32], strides = [1, 1]} : vector<8x128xf32> to vector<8x32xf32>
    %119 = arith.mulf %118, %84 : vector<8x32xf32>
    %120 = vector.extract_strided_slice %115 {offsets = [0, 0], sizes = [8, 32], strides = [1, 1]} : vector<8x128xf32> to vector<8x32xf32>
    %121 = arith.mulf %120, %117 : vector<8x32xf32>
    %122 = arith.addf %119, %121 : vector<8x32xf32>
    %123 = vector.extract_strided_slice %115 {offsets = [0, 96], sizes = [8, 32], strides = [1, 1]} : vector<8x128xf32> to vector<8x32xf32>
    %124 = math.tanh %122 : vector<8x32xf32>
    %125 = arith.mulf %123, %124 : vector<8x32xf32>
    %c16 = arith.constant 16 : index
    %c0_32 = arith.constant 0 : index
    %126 = vector.load %arg19[%c16, %c0_32] : memref<64x32xf32, #tpu.memory_space<vmem>>, vector<8x32xf32>
    tpu.vector_store %arg19[%c16, %c0_32], %110 {strides = array<i32>} : memref<64x32xf32, #tpu.memory_space<vmem>>, vector<8x32xf32>,
    %c40 = arith.constant 40 : index
    %c0_33 = arith.constant 0 : index
    %127 = vector.load %arg20[%c40, %c0_33] : memref<64x32xf32, #tpu.memory_space<vmem>>, vector<8x32xf32>
    tpu.vector_store %arg20[%c40, %c0_33], %125 {strides = array<i32>} : memref<64x32xf32, #tpu.memory_space<vmem>>, vector<8x32xf32>,
    %128 = vector.extract_strided_slice %5 {offsets = [24, 0], sizes = [8, 128], strides = [1, 1]} : vector<64x128xf32> to vector<8x128xf32>
    %cst_34 = arith.constant dense<0.000000e+00> : vector<8x128xf32>
    %129 = tpu.matmul %110, %11, %cst_34 {dimension_numbers = #tpu.dot_dimension_numbers<[1], [0], [0], [1], [0, 0, 1, 1], [], []>} : vector<8x32xf32>, vector<32x128xf32>, vector<8x128xf32> -> vector<8x128xf32>
    %130 = arith.addf %128, %129 : vector<8x128xf32>
    %131 = vector.extract_strided_slice %10 {offsets = [32, 0], sizes = [8, 128], strides = [1, 1]} : vector<64x128xf32> to vector<8x128xf32>
    %cst_35 = arith.constant dense<0.000000e+00> : vector<8x128xf32>
    %132 = tpu.matmul %125, %12, %cst_35 {dimension_numbers = #tpu.dot_dimension_numbers<[1], [0], [0], [1], [0, 0, 1, 1], [], []>} : vector<8x32xf32>, vector<32x128xf32>, vector<8x128xf32> -> vector<8x128xf32>
    %133 = arith.addf %131, %132 : vector<8x128xf32>
    %134 = arith.negf %130 : vector<8x128xf32>
    %135 = math.exp %134 : vector<8x128xf32>
    %cst_36 = arith.constant 1.000000e+00 : f32
    %136 = vector.broadcast %cst_36 : f32 to vector<8x128xf32>
    %137 = arith.addf %136, %135 : vector<8x128xf32>
    %138 = arith.divf %136, %137 : vector<8x128xf32>
    %139 = vector.extract_strided_slice %130 {offsets = [0, 64], sizes = [8, 32], strides = [1, 1]} : vector<8x128xf32> to vector<8x32xf32>
    %140 = math.tanh %139 : vector<8x32xf32>
    %141 = vector.extract_strided_slice %138 {offsets = [0, 32], sizes = [8, 32], strides = [1, 1]} : vector<8x128xf32> to vector<8x32xf32>
    %142 = arith.mulf %141, %107 : vector<8x32xf32>
    %143 = vector.extract_strided_slice %138 {offsets = [0, 0], sizes = [8, 32], strides = [1, 1]} : vector<8x128xf32> to vector<8x32xf32>
    %144 = arith.mulf %143, %140 : vector<8x32xf32>
    %145 = arith.addf %142, %144 : vector<8x32xf32>
    %146 = vector.extract_strided_slice %138 {offsets = [0, 96], sizes = [8, 32], strides = [1, 1]} : vector<8x128xf32> to vector<8x32xf32>
    %147 = math.tanh %145 : vector<8x32xf32>
    %148 = arith.mulf %146, %147 : vector<8x32xf32>
    %149 = arith.negf %133 : vector<8x128xf32>
    %150 = math.exp %149 : vector<8x128xf32>
    %cst_37 = arith.constant 1.000000e+00 : f32
    %151 = vector.broadcast %cst_37 : f32 to vector<8x128xf32>
    %152 = arith.addf %151, %150 : vector<8x128xf32>
    %153 = arith.divf %151, %152 : vector<8x128xf32>
    %154 = vector.extract_strided_slice %133 {offsets = [0, 64], sizes = [8, 32], strides = [1, 1]} : vector<8x128xf32> to vector<8x32xf32>
    %155 = math.tanh %154 : vector<8x32xf32>
    %156 = vector.extract_strided_slice %153 {offsets = [0, 32], sizes = [8, 32], strides = [1, 1]} : vector<8x128xf32> to vector<8x32xf32>
    %157 = arith.mulf %156, %122 : vector<8x32xf32>
    %158 = vector.extract_strided_slice %153 {offsets = [0, 0], sizes = [8, 32], strides = [1, 1]} : vector<8x128xf32> to vector<8x32xf32>
    %159 = arith.mulf %158, %155 : vector<8x32xf32>
    %160 = arith.addf %157, %159 : vector<8x32xf32>
    %161 = vector.extract_strided_slice %153 {offsets = [0, 96], sizes = [8, 32], strides = [1, 1]} : vector<8x128xf32> to vector<8x32xf32>
    %162 = math.tanh %160 : vector<8x32xf32>
    %163 = arith.mulf %161, %162 : vector<8x32xf32>
    %c24 = arith.constant 24 : index
    %c0_38 = arith.constant 0 : index
    %164 = vector.load %arg19[%c24, %c0_38] : memref<64x32xf32, #tpu.memory_space<vmem>>, vector<8x32xf32>
    tpu.vector_store %arg19[%c24, %c0_38], %148 {strides = array<i32>} : memref<64x32xf32, #tpu.memory_space<vmem>>, vector<8x32xf32>,
    %c32 = arith.constant 32 : index
    %c0_39 = arith.constant 0 : index
    %165 = vector.load %arg20[%c32, %c0_39] : memref<64x32xf32, #tpu.memory_space<vmem>>, vector<8x32xf32>
    tpu.vector_store %arg20[%c32, %c0_39], %163 {strides = array<i32>} : memref<64x32xf32, #tpu.memory_space<vmem>>, vector<8x32xf32>,
    %166 = vector.extract_strided_slice %5 {offsets = [32, 0], sizes = [8, 128], strides = [1, 1]} : vector<64x128xf32> to vector<8x128xf32>
    %cst_40 = arith.constant dense<0.000000e+00> : vector<8x128xf32>
    %167 = tpu.matmul %148, %11, %cst_40 {dimension_numbers = #tpu.dot_dimension_numbers<[1], [0], [0], [1], [0, 0, 1, 1], [], []>} : vector<8x32xf32>, vector<32x128xf32>, vector<8x128xf32> -> vector<8x128xf32>
    %168 = arith.addf %166, %167 : vector<8x128xf32>
    %169 = vector.extract_strided_slice %10 {offsets = [24, 0], sizes = [8, 128], strides = [1, 1]} : vector<64x128xf32> to vector<8x128xf32>
    %cst_41 = arith.constant dense<0.000000e+00> : vector<8x128xf32>
    %170 = tpu.matmul %163, %12, %cst_41 {dimension_numbers = #tpu.dot_dimension_numbers<[1], [0], [0], [1], [0, 0, 1, 1], [], []>} : vector<8x32xf32>, vector<32x128xf32>, vector<8x128xf32> -> vector<8x128xf32>
    %171 = arith.addf %169, %170 : vector<8x128xf32>
    %172 = arith.negf %168 : vector<8x128xf32>
    %173 = math.exp %172 : vector<8x128xf32>
    %cst_42 = arith.constant 1.000000e+00 : f32
    %174 = vector.broadcast %cst_42 : f32 to vector<8x128xf32>
    %175 = arith.addf %174, %173 : vector<8x128xf32>
    %176 = arith.divf %174, %175 : vector<8x128xf32>
    %177 = vector.extract_strided_slice %168 {offsets = [0, 64], sizes = [8, 32], strides = [1, 1]} : vector<8x128xf32> to vector<8x32xf32>
    %178 = math.tanh %177 : vector<8x32xf32>
    %179 = vector.extract_strided_slice %176 {offsets = [0, 32], sizes = [8, 32], strides = [1, 1]} : vector<8x128xf32> to vector<8x32xf32>
    %180 = arith.mulf %179, %145 : vector<8x32xf32>
    %181 = vector.extract_strided_slice %176 {offsets = [0, 0], sizes = [8, 32], strides = [1, 1]} : vector<8x128xf32> to vector<8x32xf32>
    %182 = arith.mulf %181, %178 : vector<8x32xf32>
    %183 = arith.addf %180, %182 : vector<8x32xf32>
    %184 = vector.extract_strided_slice %176 {offsets = [0, 96], sizes = [8, 32], strides = [1, 1]} : vector<8x128xf32> to vector<8x32xf32>
    %185 = math.tanh %183 : vector<8x32xf32>
    %186 = arith.mulf %184, %185 : vector<8x32xf32>
    %187 = arith.negf %171 : vector<8x128xf32>
    %188 = math.exp %187 : vector<8x128xf32>
    %cst_43 = arith.constant 1.000000e+00 : f32
    %189 = vector.broadcast %cst_43 : f32 to vector<8x128xf32>
    %190 = arith.addf %189, %188 : vector<8x128xf32>
    %191 = arith.divf %189, %190 : vector<8x128xf32>
    %192 = vector.extract_strided_slice %171 {offsets = [0, 64], sizes = [8, 32], strides = [1, 1]} : vector<8x128xf32> to vector<8x32xf32>
    %193 = math.tanh %192 : vector<8x32xf32>
    %194 = vector.extract_strided_slice %191 {offsets = [0, 32], sizes = [8, 32], strides = [1, 1]} : vector<8x128xf32> to vector<8x32xf32>
    %195 = arith.mulf %194, %160 : vector<8x32xf32>
    %196 = vector.extract_strided_slice %191 {offsets = [0, 0], sizes = [8, 32], strides = [1, 1]} : vector<8x128xf32> to vector<8x32xf32>
    %197 = arith.mulf %196, %193 : vector<8x32xf32>
    %198 = arith.addf %195, %197 : vector<8x32xf32>
    %199 = vector.extract_strided_slice %191 {offsets = [0, 96], sizes = [8, 32], strides = [1, 1]} : vector<8x128xf32> to vector<8x32xf32>
    %200 = math.tanh %198 : vector<8x32xf32>
    %201 = arith.mulf %199, %200 : vector<8x32xf32>
    %c32_44 = arith.constant 32 : index
    %c0_45 = arith.constant 0 : index
    %202 = vector.load %arg19[%c32_44, %c0_45] : memref<64x32xf32, #tpu.memory_space<vmem>>, vector<8x32xf32>
    tpu.vector_store %arg19[%c32_44, %c0_45], %186 {strides = array<i32>} : memref<64x32xf32, #tpu.memory_space<vmem>>, vector<8x32xf32>,
    %c24_46 = arith.constant 24 : index
    %c0_47 = arith.constant 0 : index
    %203 = vector.load %arg20[%c24_46, %c0_47] : memref<64x32xf32, #tpu.memory_space<vmem>>, vector<8x32xf32>
    tpu.vector_store %arg20[%c24_46, %c0_47], %201 {strides = array<i32>} : memref<64x32xf32, #tpu.memory_space<vmem>>, vector<8x32xf32>,
    %204 = vector.extract_strided_slice %5 {offsets = [40, 0], sizes = [8, 128], strides = [1, 1]} : vector<64x128xf32> to vector<8x128xf32>
    %cst_48 = arith.constant dense<0.000000e+00> : vector<8x128xf32>
    %205 = tpu.matmul %186, %11, %cst_48 {dimension_numbers = #tpu.dot_dimension_numbers<[1], [0], [0], [1], [0, 0, 1, 1], [], []>} : vector<8x32xf32>, vector<32x128xf32>, vector<8x128xf32> -> vector<8x128xf32>
    %206 = arith.addf %204, %205 : vector<8x128xf32>
    %207 = vector.extract_strided_slice %10 {offsets = [16, 0], sizes = [8, 128], strides = [1, 1]} : vector<64x128xf32> to vector<8x128xf32>
    %cst_49 = arith.constant dense<0.000000e+00> : vector<8x128xf32>
    %208 = tpu.matmul %201, %12, %cst_49 {dimension_numbers = #tpu.dot_dimension_numbers<[1], [0], [0], [1], [0, 0, 1, 1], [], []>} : vector<8x32xf32>, vector<32x128xf32>, vector<8x128xf32> -> vector<8x128xf32>
    %209 = arith.addf %207, %208 : vector<8x128xf32>
    %210 = arith.negf %206 : vector<8x128xf32>
    %211 = math.exp %210 : vector<8x128xf32>
    %cst_50 = arith.constant 1.000000e+00 : f32
    %212 = vector.broadcast %cst_50 : f32 to vector<8x128xf32>
    %213 = arith.addf %212, %211 : vector<8x128xf32>
    %214 = arith.divf %212, %213 : vector<8x128xf32>
    %215 = vector.extract_strided_slice %206 {offsets = [0, 64], sizes = [8, 32], strides = [1, 1]} : vector<8x128xf32> to vector<8x32xf32>
    %216 = math.tanh %215 : vector<8x32xf32>
    %217 = vector.extract_strided_slice %214 {offsets = [0, 32], sizes = [8, 32], strides = [1, 1]} : vector<8x128xf32> to vector<8x32xf32>
    %218 = arith.mulf %217, %183 : vector<8x32xf32>
    %219 = vector.extract_strided_slice %214 {offsets = [0, 0], sizes = [8, 32], strides = [1, 1]} : vector<8x128xf32> to vector<8x32xf32>
    %220 = arith.mulf %219, %216 : vector<8x32xf32>
    %221 = arith.addf %218, %220 : vector<8x32xf32>
    %222 = vector.extract_strided_slice %214 {offsets = [0, 96], sizes = [8, 32], strides = [1, 1]} : vector<8x128xf32> to vector<8x32xf32>
    %223 = math.tanh %221 : vector<8x32xf32>
    %224 = arith.mulf %222, %223 : vector<8x32xf32>
    %225 = arith.negf %209 : vector<8x128xf32>
    %226 = math.exp %225 : vector<8x128xf32>
    %cst_51 = arith.constant 1.000000e+00 : f32
    %227 = vector.broadcast %cst_51 : f32 to vector<8x128xf32>
    %228 = arith.addf %227, %226 : vector<8x128xf32>
    %229 = arith.divf %227, %228 : vector<8x128xf32>
    %230 = vector.extract_strided_slice %209 {offsets = [0, 64], sizes = [8, 32], strides = [1, 1]} : vector<8x128xf32> to vector<8x32xf32>
    %231 = math.tanh %230 : vector<8x32xf32>
    %232 = vector.extract_strided_slice %229 {offsets = [0, 32], sizes = [8, 32], strides = [1, 1]} : vector<8x128xf32> to vector<8x32xf32>
    %233 = arith.mulf %232, %198 : vector<8x32xf32>
    %234 = vector.extract_strided_slice %229 {offsets = [0, 0], sizes = [8, 32], strides = [1, 1]} : vector<8x128xf32> to vector<8x32xf32>
    %235 = arith.mulf %234, %231 : vector<8x32xf32>
    %236 = arith.addf %233, %235 : vector<8x32xf32>
    %237 = vector.extract_strided_slice %229 {offsets = [0, 96], sizes = [8, 32], strides = [1, 1]} : vector<8x128xf32> to vector<8x32xf32>
    %238 = math.tanh %236 : vector<8x32xf32>
    %239 = arith.mulf %237, %238 : vector<8x32xf32>
    %c40_52 = arith.constant 40 : index
    %c0_53 = arith.constant 0 : index
    %240 = vector.load %arg19[%c40_52, %c0_53] : memref<64x32xf32, #tpu.memory_space<vmem>>, vector<8x32xf32>
    tpu.vector_store %arg19[%c40_52, %c0_53], %224 {strides = array<i32>} : memref<64x32xf32, #tpu.memory_space<vmem>>, vector<8x32xf32>,
    %c16_54 = arith.constant 16 : index
    %c0_55 = arith.constant 0 : index
    %241 = vector.load %arg20[%c16_54, %c0_55] : memref<64x32xf32, #tpu.memory_space<vmem>>, vector<8x32xf32>
    tpu.vector_store %arg20[%c16_54, %c0_55], %239 {strides = array<i32>} : memref<64x32xf32, #tpu.memory_space<vmem>>, vector<8x32xf32>,
    %242 = vector.extract_strided_slice %5 {offsets = [48, 0], sizes = [8, 128], strides = [1, 1]} : vector<64x128xf32> to vector<8x128xf32>
    %cst_56 = arith.constant dense<0.000000e+00> : vector<8x128xf32>
    %243 = tpu.matmul %224, %11, %cst_56 {dimension_numbers = #tpu.dot_dimension_numbers<[1], [0], [0], [1], [0, 0, 1, 1], [], []>} : vector<8x32xf32>, vector<32x128xf32>, vector<8x128xf32> -> vector<8x128xf32>
    %244 = arith.addf %242, %243 : vector<8x128xf32>
    %245 = vector.extract_strided_slice %10 {offsets = [8, 0], sizes = [8, 128], strides = [1, 1]} : vector<64x128xf32> to vector<8x128xf32>
    %cst_57 = arith.constant dense<0.000000e+00> : vector<8x128xf32>
    %246 = tpu.matmul %239, %12, %cst_57 {dimension_numbers = #tpu.dot_dimension_numbers<[1], [0], [0], [1], [0, 0, 1, 1], [], []>} : vector<8x32xf32>, vector<32x128xf32>, vector<8x128xf32> -> vector<8x128xf32>
    %247 = arith.addf %245, %246 : vector<8x128xf32>
    %248 = arith.negf %244 : vector<8x128xf32>
    %249 = math.exp %248 : vector<8x128xf32>
    %cst_58 = arith.constant 1.000000e+00 : f32
    %250 = vector.broadcast %cst_58 : f32 to vector<8x128xf32>
    %251 = arith.addf %250, %249 : vector<8x128xf32>
    %252 = arith.divf %250, %251 : vector<8x128xf32>
    %253 = vector.extract_strided_slice %244 {offsets = [0, 64], sizes = [8, 32], strides = [1, 1]} : vector<8x128xf32> to vector<8x32xf32>
    %254 = math.tanh %253 : vector<8x32xf32>
    %255 = vector.extract_strided_slice %252 {offsets = [0, 32], sizes = [8, 32], strides = [1, 1]} : vector<8x128xf32> to vector<8x32xf32>
    %256 = arith.mulf %255, %221 : vector<8x32xf32>
    %257 = vector.extract_strided_slice %252 {offsets = [0, 0], sizes = [8, 32], strides = [1, 1]} : vector<8x128xf32> to vector<8x32xf32>
    %258 = arith.mulf %257, %254 : vector<8x32xf32>
    %259 = arith.addf %256, %258 : vector<8x32xf32>
    %260 = vector.extract_strided_slice %252 {offsets = [0, 96], sizes = [8, 32], strides = [1, 1]} : vector<8x128xf32> to vector<8x32xf32>
    %261 = math.tanh %259 : vector<8x32xf32>
    %262 = arith.mulf %260, %261 : vector<8x32xf32>
    %263 = arith.negf %247 : vector<8x128xf32>
    %264 = math.exp %263 : vector<8x128xf32>
    %cst_59 = arith.constant 1.000000e+00 : f32
    %265 = vector.broadcast %cst_59 : f32 to vector<8x128xf32>
    %266 = arith.addf %265, %264 : vector<8x128xf32>
    %267 = arith.divf %265, %266 : vector<8x128xf32>
    %268 = vector.extract_strided_slice %247 {offsets = [0, 64], sizes = [8, 32], strides = [1, 1]} : vector<8x128xf32> to vector<8x32xf32>
    %269 = math.tanh %268 : vector<8x32xf32>
    %270 = vector.extract_strided_slice %267 {offsets = [0, 32], sizes = [8, 32], strides = [1, 1]} : vector<8x128xf32> to vector<8x32xf32>
    %271 = arith.mulf %270, %236 : vector<8x32xf32>
    %272 = vector.extract_strided_slice %267 {offsets = [0, 0], sizes = [8, 32], strides = [1, 1]} : vector<8x128xf32> to vector<8x32xf32>
    %273 = arith.mulf %272, %269 : vector<8x32xf32>
    %274 = arith.addf %271, %273 : vector<8x32xf32>
    %275 = vector.extract_strided_slice %267 {offsets = [0, 96], sizes = [8, 32], strides = [1, 1]} : vector<8x128xf32> to vector<8x32xf32>
    %276 = math.tanh %274 : vector<8x32xf32>
    %277 = arith.mulf %275, %276 : vector<8x32xf32>
    %c48_60 = arith.constant 48 : index
    %c0_61 = arith.constant 0 : index
    %278 = vector.load %arg19[%c48_60, %c0_61] : memref<64x32xf32, #tpu.memory_space<vmem>>, vector<8x32xf32>
    tpu.vector_store %arg19[%c48_60, %c0_61], %262 {strides = array<i32>} : memref<64x32xf32, #tpu.memory_space<vmem>>, vector<8x32xf32>,
    %c8_62 = arith.constant 8 : index
    %c0_63 = arith.constant 0 : index
    %279 = vector.load %arg20[%c8_62, %c0_63] : memref<64x32xf32, #tpu.memory_space<vmem>>, vector<8x32xf32>
    tpu.vector_store %arg20[%c8_62, %c0_63], %277 {strides = array<i32>} : memref<64x32xf32, #tpu.memory_space<vmem>>, vector<8x32xf32>,
    %280 = vector.extract_strided_slice %5 {offsets = [56, 0], sizes = [8, 128], strides = [1, 1]} : vector<64x128xf32> to vector<8x128xf32>
    %cst_64 = arith.constant dense<0.000000e+00> : vector<8x128xf32>
    %281 = tpu.matmul %262, %11, %cst_64 {dimension_numbers = #tpu.dot_dimension_numbers<[1], [0], [0], [1], [0, 0, 1, 1], [], []>} : vector<8x32xf32>, vector<32x128xf32>, vector<8x128xf32> -> vector<8x128xf32>
    %282 = arith.addf %280, %281 : vector<8x128xf32>
    %283 = vector.extract_strided_slice %10 {offsets = [0, 0], sizes = [8, 128], strides = [1, 1]} : vector<64x128xf32> to vector<8x128xf32>
    %cst_65 = arith.constant dense<0.000000e+00> : vector<8x128xf32>
    %284 = tpu.matmul %277, %12, %cst_65 {dimension_numbers = #tpu.dot_dimension_numbers<[1], [0], [0], [1], [0, 0, 1, 1], [], []>} : vector<8x32xf32>, vector<32x128xf32>, vector<8x128xf32> -> vector<8x128xf32>
    %285 = arith.addf %283, %284 : vector<8x128xf32>
    %286 = arith.negf %282 : vector<8x128xf32>
    %287 = math.exp %286 : vector<8x128xf32>
    %cst_66 = arith.constant 1.000000e+00 : f32
    %288 = vector.broadcast %cst_66 : f32 to vector<8x128xf32>
    %289 = arith.addf %288, %287 : vector<8x128xf32>
    %290 = arith.divf %288, %289 : vector<8x128xf32>
    %291 = vector.extract_strided_slice %282 {offsets = [0, 64], sizes = [8, 32], strides = [1, 1]} : vector<8x128xf32> to vector<8x32xf32>
    %292 = math.tanh %291 : vector<8x32xf32>
    %293 = vector.extract_strided_slice %290 {offsets = [0, 32], sizes = [8, 32], strides = [1, 1]} : vector<8x128xf32> to vector<8x32xf32>
    %294 = arith.mulf %293, %259 : vector<8x32xf32>
    %295 = vector.extract_strided_slice %290 {offsets = [0, 0], sizes = [8, 32], strides = [1, 1]} : vector<8x128xf32> to vector<8x32xf32>
    %296 = arith.mulf %295, %292 : vector<8x32xf32>
    %297 = arith.addf %294, %296 : vector<8x32xf32>
    %298 = vector.extract_strided_slice %290 {offsets = [0, 96], sizes = [8, 32], strides = [1, 1]} : vector<8x128xf32> to vector<8x32xf32>
    %299 = math.tanh %297 : vector<8x32xf32>
    %300 = arith.mulf %298, %299 : vector<8x32xf32>
    %301 = arith.negf %285 : vector<8x128xf32>
    %302 = math.exp %301 : vector<8x128xf32>
    %cst_67 = arith.constant 1.000000e+00 : f32
    %303 = vector.broadcast %cst_67 : f32 to vector<8x128xf32>
    %304 = arith.addf %303, %302 : vector<8x128xf32>
    %305 = arith.divf %303, %304 : vector<8x128xf32>
    %306 = vector.extract_strided_slice %285 {offsets = [0, 64], sizes = [8, 32], strides = [1, 1]} : vector<8x128xf32> to vector<8x32xf32>
    %307 = math.tanh %306 : vector<8x32xf32>
    %308 = vector.extract_strided_slice %305 {offsets = [0, 32], sizes = [8, 32], strides = [1, 1]} : vector<8x128xf32> to vector<8x32xf32>
    %309 = arith.mulf %308, %274 : vector<8x32xf32>
    %310 = vector.extract_strided_slice %305 {offsets = [0, 0], sizes = [8, 32], strides = [1, 1]} : vector<8x128xf32> to vector<8x32xf32>
    %311 = arith.mulf %310, %307 : vector<8x32xf32>
    %312 = arith.addf %309, %311 : vector<8x32xf32>
    %313 = vector.extract_strided_slice %305 {offsets = [0, 96], sizes = [8, 32], strides = [1, 1]} : vector<8x128xf32> to vector<8x32xf32>
    %314 = math.tanh %312 : vector<8x32xf32>
    %315 = arith.mulf %313, %314 : vector<8x32xf32>
    %c56_68 = arith.constant 56 : index
    %c0_69 = arith.constant 0 : index
    %316 = vector.load %arg19[%c56_68, %c0_69] : memref<64x32xf32, #tpu.memory_space<vmem>>, vector<8x32xf32>
    tpu.vector_store %arg19[%c56_68, %c0_69], %300 {strides = array<i32>} : memref<64x32xf32, #tpu.memory_space<vmem>>, vector<8x32xf32>,
    %c0_70 = arith.constant 0 : index
    %c0_71 = arith.constant 0 : index
    %317 = vector.load %arg20[%c0_70, %c0_71] : memref<64x32xf32, #tpu.memory_space<vmem>>, vector<8x32xf32>
    tpu.vector_store %arg20[%c0_70, %c0_71], %315 {strides = array<i32>} : memref<64x32xf32, #tpu.memory_space<vmem>>, vector<8x32xf32>,
    %c0_72 = arith.constant 0 : index
    %c0_73 = arith.constant 0 : index
    %318 = vector.load %arg19[%c0_72, %c0_73] : memref<64x32xf32, #tpu.memory_space<vmem>>, vector<64x32xf32>
    %c0_74 = arith.constant 0 : index
    %c0_75 = arith.constant 0 : index
    %319 = vector.load %arg20[%c0_74, %c0_75] : memref<64x32xf32, #tpu.memory_space<vmem>>, vector<64x32xf32>
    %c0_76 = arith.constant 0 : index
    %c0_77 = arith.constant 0 : index
    %320 = vector.load %arg7[%c0_76, %c0_77] : memref<32x128xf32, #tpu.memory_space<vmem>>, vector<32x128xf32>
    %cst_78 = arith.constant dense<0.000000e+00> : vector<64x128xf32>
    %321 = tpu.matmul %318, %320, %cst_78 {dimension_numbers = #tpu.dot_dimension_numbers<[1], [0], [0], [1], [0, 0, 1, 1], [], []>} : vector<64x32xf32>, vector<32x128xf32>, vector<64x128xf32> -> vector<64x128xf32>
    %c0_79 = arith.constant 0 : index
    %c0_80 = arith.constant 0 : index
    %322 = vector.load %arg8[%c0_79, %c0_80] : memref<32x128xf32, #tpu.memory_space<vmem>>, vector<32x128xf32>
    %cst_81 = arith.constant dense<0.000000e+00> : vector<64x128xf32>
    %323 = tpu.matmul %319, %322, %cst_81 {dimension_numbers = #tpu.dot_dimension_numbers<[1], [0], [0], [1], [0, 0, 1, 1], [], []>} : vector<64x32xf32>, vector<32x128xf32>, vector<64x128xf32> -> vector<64x128xf32>
    %324 = arith.addf %321, %323 : vector<64x128xf32>
    %c0_82 = arith.constant 0 : index
    %c0_83 = arith.constant 0 : index
    %325 = vector.load %arg10[%c0_82, %c0_83] : memref<1x128xf32, #tpu.memory_space<vmem>>, vector<1x128xf32>
    %326 = vector.broadcast %325 : vector<1x128xf32> to vector<64x128xf32>
    %327 = arith.addf %324, %326 : vector<64x128xf32>
    %c0_84 = arith.constant 0 : index
    %c0_85 = arith.constant 0 : index
    %328 = vector.load %arg11[%c0_84, %c0_85] : memref<32x128xf32, #tpu.memory_space<vmem>>, vector<32x128xf32>
    %cst_86 = arith.constant dense<0.000000e+00> : vector<64x128xf32>
    %329 = tpu.matmul %318, %328, %cst_86 {dimension_numbers = #tpu.dot_dimension_numbers<[1], [0], [0], [1], [0, 0, 1, 1], [], []>} : vector<64x32xf32>, vector<32x128xf32>, vector<64x128xf32> -> vector<64x128xf32>
    %c0_87 = arith.constant 0 : index
    %c0_88 = arith.constant 0 : index
    %330 = vector.load %arg12[%c0_87, %c0_88] : memref<32x128xf32, #tpu.memory_space<vmem>>, vector<32x128xf32>
    %cst_89 = arith.constant dense<0.000000e+00> : vector<64x128xf32>
    %331 = tpu.matmul %319, %330, %cst_89 {dimension_numbers = #tpu.dot_dimension_numbers<[1], [0], [0], [1], [0, 0, 1, 1], [], []>} : vector<64x32xf32>, vector<32x128xf32>, vector<64x128xf32> -> vector<64x128xf32>
    %332 = arith.addf %329, %331 : vector<64x128xf32>
    %c0_90 = arith.constant 0 : index
    %c0_91 = arith.constant 0 : index
    %333 = vector.load %arg14[%c0_90, %c0_91] : memref<1x128xf32, #tpu.memory_space<vmem>>, vector<1x128xf32>
    %334 = vector.broadcast %333 : vector<1x128xf32> to vector<64x128xf32>
    %335 = arith.addf %332, %334 : vector<64x128xf32>
    %c0_92 = arith.constant 0 : index
    %c0_93 = arith.constant 0 : index
    %336 = vector.load %arg9[%c0_92, %c0_93] : memref<32x128xf32, #tpu.memory_space<vmem>>, vector<32x128xf32>
    %c0_94 = arith.constant 0 : index
    %c0_95 = arith.constant 0 : index
    %337 = vector.load %arg13[%c0_94, %c0_95] : memref<32x128xf32, #tpu.memory_space<vmem>>, vector<32x128xf32>
    %cst_96 = arith.constant 0.000000e+00 : f32
    %338 = vector.broadcast %cst_96 : f32 to vector<8x32xf32>
    %339 = vector.extract_strided_slice %327 {offsets = [0, 0], sizes = [8, 128], strides = [1, 1]} : vector<64x128xf32> to vector<8x128xf32>
    %cst_97 = arith.constant dense<0.000000e+00> : vector<8x128xf32>
    %340 = tpu.matmul %338, %336, %cst_97 {dimension_numbers = #tpu.dot_dimension_numbers<[1], [0], [0], [1], [0, 0, 1, 1], [], []>} : vector<8x32xf32>, vector<32x128xf32>, vector<8x128xf32> -> vector<8x128xf32>
    %341 = arith.addf %339, %340 : vector<8x128xf32>
    %342 = vector.extract_strided_slice %335 {offsets = [56, 0], sizes = [8, 128], strides = [1, 1]} : vector<64x128xf32> to vector<8x128xf32>
    %cst_98 = arith.constant dense<0.000000e+00> : vector<8x128xf32>
    %343 = tpu.matmul %338, %337, %cst_98 {dimension_numbers = #tpu.dot_dimension_numbers<[1], [0], [0], [1], [0, 0, 1, 1], [], []>} : vector<8x32xf32>, vector<32x128xf32>, vector<8x128xf32> -> vector<8x128xf32>
    %344 = arith.addf %342, %343 : vector<8x128xf32>
    %345 = arith.negf %341 : vector<8x128xf32>
    %346 = math.exp %345 : vector<8x128xf32>
    %cst_99 = arith.constant 1.000000e+00 : f32
    %347 = vector.broadcast %cst_99 : f32 to vector<8x128xf32>
    %348 = arith.addf %347, %346 : vector<8x128xf32>
    %349 = arith.divf %347, %348 : vector<8x128xf32>
    %350 = vector.extract_strided_slice %341 {offsets = [0, 64], sizes = [8, 32], strides = [1, 1]} : vector<8x128xf32> to vector<8x32xf32>
    %351 = math.tanh %350 : vector<8x32xf32>
    %352 = vector.extract_strided_slice %349 {offsets = [0, 32], sizes = [8, 32], strides = [1, 1]} : vector<8x128xf32> to vector<8x32xf32>
    %353 = arith.mulf %352, %338 : vector<8x32xf32>
    %354 = vector.extract_strided_slice %349 {offsets = [0, 0], sizes = [8, 32], strides = [1, 1]} : vector<8x128xf32> to vector<8x32xf32>
    %355 = arith.mulf %354, %351 : vector<8x32xf32>
    %356 = arith.addf %353, %355 : vector<8x32xf32>
    %357 = vector.extract_strided_slice %349 {offsets = [0, 96], sizes = [8, 32], strides = [1, 1]} : vector<8x128xf32> to vector<8x32xf32>
    %358 = math.tanh %356 : vector<8x32xf32>
    %359 = arith.mulf %357, %358 : vector<8x32xf32>
    %360 = arith.negf %344 : vector<8x128xf32>
    %361 = math.exp %360 : vector<8x128xf32>
    %cst_100 = arith.constant 1.000000e+00 : f32
    %362 = vector.broadcast %cst_100 : f32 to vector<8x128xf32>
    %363 = arith.addf %362, %361 : vector<8x128xf32>
    %364 = arith.divf %362, %363 : vector<8x128xf32>
    %365 = vector.extract_strided_slice %344 {offsets = [0, 64], sizes = [8, 32], strides = [1, 1]} : vector<8x128xf32> to vector<8x32xf32>
    %366 = math.tanh %365 : vector<8x32xf32>
    %367 = vector.extract_strided_slice %364 {offsets = [0, 32], sizes = [8, 32], strides = [1, 1]} : vector<8x128xf32> to vector<8x32xf32>
    %368 = arith.mulf %367, %338 : vector<8x32xf32>
    %369 = vector.extract_strided_slice %364 {offsets = [0, 0], sizes = [8, 32], strides = [1, 1]} : vector<8x128xf32> to vector<8x32xf32>
    %370 = arith.mulf %369, %366 : vector<8x32xf32>
    %371 = arith.addf %368, %370 : vector<8x32xf32>
    %372 = vector.extract_strided_slice %364 {offsets = [0, 96], sizes = [8, 32], strides = [1, 1]} : vector<8x128xf32> to vector<8x32xf32>
    %373 = math.tanh %371 : vector<8x32xf32>
    %374 = arith.mulf %372, %373 : vector<8x32xf32>
    %375 = vector.extract_strided_slice %327 {offsets = [8, 0], sizes = [8, 128], strides = [1, 1]} : vector<64x128xf32> to vector<8x128xf32>
    %cst_101 = arith.constant dense<0.000000e+00> : vector<8x128xf32>
    %376 = tpu.matmul %359, %336, %cst_101 {dimension_numbers = #tpu.dot_dimension_numbers<[1], [0], [0], [1], [0, 0, 1, 1], [], []>} : vector<8x32xf32>, vector<32x128xf32>, vector<8x128xf32> -> vector<8x128xf32>
    %377 = arith.addf %375, %376 : vector<8x128xf32>
    %378 = arith.negf %377 : vector<8x128xf32>
    %379 = math.exp %378 : vector<8x128xf32>
    %cst_102 = arith.constant 1.000000e+00 : f32
    %380 = vector.broadcast %cst_102 : f32 to vector<8x128xf32>
    %381 = arith.addf %380, %379 : vector<8x128xf32>
    %382 = arith.divf %380, %381 : vector<8x128xf32>
    %383 = vector.extract_strided_slice %377 {offsets = [0, 64], sizes = [8, 32], strides = [1, 1]} : vector<8x128xf32> to vector<8x32xf32>
    %384 = math.tanh %383 : vector<8x32xf32>
    %385 = vector.extract_strided_slice %382 {offsets = [0, 32], sizes = [8, 32], strides = [1, 1]} : vector<8x128xf32> to vector<8x32xf32>
    %386 = arith.mulf %385, %356 : vector<8x32xf32>
    %387 = vector.extract_strided_slice %382 {offsets = [0, 0], sizes = [8, 32], strides = [1, 1]} : vector<8x128xf32> to vector<8x32xf32>
    %388 = arith.mulf %387, %384 : vector<8x32xf32>
    %389 = arith.addf %386, %388 : vector<8x32xf32>
    %390 = vector.extract_strided_slice %382 {offsets = [0, 96], sizes = [8, 32], strides = [1, 1]} : vector<8x128xf32> to vector<8x32xf32>
    %391 = math.tanh %389 : vector<8x32xf32>
    %392 = arith.mulf %390, %391 : vector<8x32xf32>
    %393 = vector.extract_strided_slice %327 {offsets = [16, 0], sizes = [8, 128], strides = [1, 1]} : vector<64x128xf32> to vector<8x128xf32>
    %cst_103 = arith.constant dense<0.000000e+00> : vector<8x128xf32>
    %394 = tpu.matmul %392, %336, %cst_103 {dimension_numbers = #tpu.dot_dimension_numbers<[1], [0], [0], [1], [0, 0, 1, 1], [], []>} : vector<8x32xf32>, vector<32x128xf32>, vector<8x128xf32> -> vector<8x128xf32>
    %395 = arith.addf %393, %394 : vector<8x128xf32>
    %396 = arith.negf %395 : vector<8x128xf32>
    %397 = math.exp %396 : vector<8x128xf32>
    %cst_104 = arith.constant 1.000000e+00 : f32
    %398 = vector.broadcast %cst_104 : f32 to vector<8x128xf32>
    %399 = arith.addf %398, %397 : vector<8x128xf32>
    %400 = arith.divf %398, %399 : vector<8x128xf32>
    %401 = vector.extract_strided_slice %395 {offsets = [0, 64], sizes = [8, 32], strides = [1, 1]} : vector<8x128xf32> to vector<8x32xf32>
    %402 = math.tanh %401 : vector<8x32xf32>
    %403 = vector.extract_strided_slice %400 {offsets = [0, 32], sizes = [8, 32], strides = [1, 1]} : vector<8x128xf32> to vector<8x32xf32>
    %404 = arith.mulf %403, %389 : vector<8x32xf32>
    %405 = vector.extract_strided_slice %400 {offsets = [0, 0], sizes = [8, 32], strides = [1, 1]} : vector<8x128xf32> to vector<8x32xf32>
    %406 = arith.mulf %405, %402 : vector<8x32xf32>
    %407 = arith.addf %404, %406 : vector<8x32xf32>
    %408 = vector.extract_strided_slice %400 {offsets = [0, 96], sizes = [8, 32], strides = [1, 1]} : vector<8x128xf32> to vector<8x32xf32>
    %409 = math.tanh %407 : vector<8x32xf32>
    %410 = arith.mulf %408, %409 : vector<8x32xf32>
    %411 = vector.extract_strided_slice %327 {offsets = [24, 0], sizes = [8, 128], strides = [1, 1]} : vector<64x128xf32> to vector<8x128xf32>
    %cst_105 = arith.constant dense<0.000000e+00> : vector<8x128xf32>
    %412 = tpu.matmul %410, %336, %cst_105 {dimension_numbers = #tpu.dot_dimension_numbers<[1], [0], [0], [1], [0, 0, 1, 1], [], []>} : vector<8x32xf32>, vector<32x128xf32>, vector<8x128xf32> -> vector<8x128xf32>
    %413 = arith.addf %411, %412 : vector<8x128xf32>
    %414 = arith.negf %413 : vector<8x128xf32>
    %415 = math.exp %414 : vector<8x128xf32>
    %cst_106 = arith.constant 1.000000e+00 : f32
    %416 = vector.broadcast %cst_106 : f32 to vector<8x128xf32>
    %417 = arith.addf %416, %415 : vector<8x128xf32>
    %418 = arith.divf %416, %417 : vector<8x128xf32>
    %419 = vector.extract_strided_slice %413 {offsets = [0, 64], sizes = [8, 32], strides = [1, 1]} : vector<8x128xf32> to vector<8x32xf32>
    %420 = math.tanh %419 : vector<8x32xf32>
    %421 = vector.extract_strided_slice %418 {offsets = [0, 32], sizes = [8, 32], strides = [1, 1]} : vector<8x128xf32> to vector<8x32xf32>
    %422 = arith.mulf %421, %407 : vector<8x32xf32>
    %423 = vector.extract_strided_slice %418 {offsets = [0, 0], sizes = [8, 32], strides = [1, 1]} : vector<8x128xf32> to vector<8x32xf32>
    %424 = arith.mulf %423, %420 : vector<8x32xf32>
    %425 = arith.addf %422, %424 : vector<8x32xf32>
    %426 = vector.extract_strided_slice %418 {offsets = [0, 96], sizes = [8, 32], strides = [1, 1]} : vector<8x128xf32> to vector<8x32xf32>
    %427 = math.tanh %425 : vector<8x32xf32>
    %428 = arith.mulf %426, %427 : vector<8x32xf32>
    %429 = vector.extract_strided_slice %327 {offsets = [32, 0], sizes = [8, 128], strides = [1, 1]} : vector<64x128xf32> to vector<8x128xf32>
    %cst_107 = arith.constant dense<0.000000e+00> : vector<8x128xf32>
    %430 = tpu.matmul %428, %336, %cst_107 {dimension_numbers = #tpu.dot_dimension_numbers<[1], [0], [0], [1], [0, 0, 1, 1], [], []>} : vector<8x32xf32>, vector<32x128xf32>, vector<8x128xf32> -> vector<8x128xf32>
    %431 = arith.addf %429, %430 : vector<8x128xf32>
    %432 = arith.negf %431 : vector<8x128xf32>
    %433 = math.exp %432 : vector<8x128xf32>
    %cst_108 = arith.constant 1.000000e+00 : f32
    %434 = vector.broadcast %cst_108 : f32 to vector<8x128xf32>
    %435 = arith.addf %434, %433 : vector<8x128xf32>
    %436 = arith.divf %434, %435 : vector<8x128xf32>
    %437 = vector.extract_strided_slice %431 {offsets = [0, 64], sizes = [8, 32], strides = [1, 1]} : vector<8x128xf32> to vector<8x32xf32>
    %438 = math.tanh %437 : vector<8x32xf32>
    %439 = vector.extract_strided_slice %436 {offsets = [0, 32], sizes = [8, 32], strides = [1, 1]} : vector<8x128xf32> to vector<8x32xf32>
    %440 = arith.mulf %439, %425 : vector<8x32xf32>
    %441 = vector.extract_strided_slice %436 {offsets = [0, 0], sizes = [8, 32], strides = [1, 1]} : vector<8x128xf32> to vector<8x32xf32>
    %442 = arith.mulf %441, %438 : vector<8x32xf32>
    %443 = arith.addf %440, %442 : vector<8x32xf32>
    %444 = vector.extract_strided_slice %436 {offsets = [0, 96], sizes = [8, 32], strides = [1, 1]} : vector<8x128xf32> to vector<8x32xf32>
    %445 = math.tanh %443 : vector<8x32xf32>
    %446 = arith.mulf %444, %445 : vector<8x32xf32>
    %447 = vector.extract_strided_slice %327 {offsets = [40, 0], sizes = [8, 128], strides = [1, 1]} : vector<64x128xf32> to vector<8x128xf32>
    %cst_109 = arith.constant dense<0.000000e+00> : vector<8x128xf32>
    %448 = tpu.matmul %446, %336, %cst_109 {dimension_numbers = #tpu.dot_dimension_numbers<[1], [0], [0], [1], [0, 0, 1, 1], [], []>} : vector<8x32xf32>, vector<32x128xf32>, vector<8x128xf32> -> vector<8x128xf32>
    %449 = arith.addf %447, %448 : vector<8x128xf32>
    %450 = arith.negf %449 : vector<8x128xf32>
    %451 = math.exp %450 : vector<8x128xf32>
    %cst_110 = arith.constant 1.000000e+00 : f32
    %452 = vector.broadcast %cst_110 : f32 to vector<8x128xf32>
    %453 = arith.addf %452, %451 : vector<8x128xf32>
    %454 = arith.divf %452, %453 : vector<8x128xf32>
    %455 = vector.extract_strided_slice %449 {offsets = [0, 64], sizes = [8, 32], strides = [1, 1]} : vector<8x128xf32> to vector<8x32xf32>
    %456 = math.tanh %455 : vector<8x32xf32>
    %457 = vector.extract_strided_slice %454 {offsets = [0, 32], sizes = [8, 32], strides = [1, 1]} : vector<8x128xf32> to vector<8x32xf32>
    %458 = arith.mulf %457, %443 : vector<8x32xf32>
    %459 = vector.extract_strided_slice %454 {offsets = [0, 0], sizes = [8, 32], strides = [1, 1]} : vector<8x128xf32> to vector<8x32xf32>
    %460 = arith.mulf %459, %456 : vector<8x32xf32>
    %461 = arith.addf %458, %460 : vector<8x32xf32>
    %462 = vector.extract_strided_slice %454 {offsets = [0, 96], sizes = [8, 32], strides = [1, 1]} : vector<8x128xf32> to vector<8x32xf32>
    %463 = math.tanh %461 : vector<8x32xf32>
    %464 = arith.mulf %462, %463 : vector<8x32xf32>
    %465 = vector.extract_strided_slice %327 {offsets = [48, 0], sizes = [8, 128], strides = [1, 1]} : vector<64x128xf32> to vector<8x128xf32>
    %cst_111 = arith.constant dense<0.000000e+00> : vector<8x128xf32>
    %466 = tpu.matmul %464, %336, %cst_111 {dimension_numbers = #tpu.dot_dimension_numbers<[1], [0], [0], [1], [0, 0, 1, 1], [], []>} : vector<8x32xf32>, vector<32x128xf32>, vector<8x128xf32> -> vector<8x128xf32>
    %467 = arith.addf %465, %466 : vector<8x128xf32>
    %468 = arith.negf %467 : vector<8x128xf32>
    %469 = math.exp %468 : vector<8x128xf32>
    %cst_112 = arith.constant 1.000000e+00 : f32
    %470 = vector.broadcast %cst_112 : f32 to vector<8x128xf32>
    %471 = arith.addf %470, %469 : vector<8x128xf32>
    %472 = arith.divf %470, %471 : vector<8x128xf32>
    %473 = vector.extract_strided_slice %467 {offsets = [0, 64], sizes = [8, 32], strides = [1, 1]} : vector<8x128xf32> to vector<8x32xf32>
    %474 = math.tanh %473 : vector<8x32xf32>
    %475 = vector.extract_strided_slice %472 {offsets = [0, 32], sizes = [8, 32], strides = [1, 1]} : vector<8x128xf32> to vector<8x32xf32>
    %476 = arith.mulf %475, %461 : vector<8x32xf32>
    %477 = vector.extract_strided_slice %472 {offsets = [0, 0], sizes = [8, 32], strides = [1, 1]} : vector<8x128xf32> to vector<8x32xf32>
    %478 = arith.mulf %477, %474 : vector<8x32xf32>
    %479 = arith.addf %476, %478 : vector<8x32xf32>
    %480 = vector.extract_strided_slice %472 {offsets = [0, 96], sizes = [8, 32], strides = [1, 1]} : vector<8x128xf32> to vector<8x32xf32>
    %481 = math.tanh %479 : vector<8x32xf32>
    %482 = arith.mulf %480, %481 : vector<8x32xf32>
    %483 = vector.extract_strided_slice %327 {offsets = [56, 0], sizes = [8, 128], strides = [1, 1]} : vector<64x128xf32> to vector<8x128xf32>
    %cst_113 = arith.constant dense<0.000000e+00> : vector<8x128xf32>
    %484 = tpu.matmul %482, %336, %cst_113 {dimension_numbers = #tpu.dot_dimension_numbers<[1], [0], [0], [1], [0, 0, 1, 1], [], []>} : vector<8x32xf32>, vector<32x128xf32>, vector<8x128xf32> -> vector<8x128xf32>
    %485 = arith.addf %483, %484 : vector<8x128xf32>
    %486 = arith.negf %485 : vector<8x128xf32>
    %487 = math.exp %486 : vector<8x128xf32>
    %cst_114 = arith.constant 1.000000e+00 : f32
    %488 = vector.broadcast %cst_114 : f32 to vector<8x128xf32>
    %489 = arith.addf %488, %487 : vector<8x128xf32>
    %490 = arith.divf %488, %489 : vector<8x128xf32>
    %491 = vector.extract_strided_slice %485 {offsets = [0, 64], sizes = [8, 32], strides = [1, 1]} : vector<8x128xf32> to vector<8x32xf32>
    %492 = math.tanh %491 : vector<8x32xf32>
    %493 = vector.extract_strided_slice %490 {offsets = [0, 32], sizes = [8, 32], strides = [1, 1]} : vector<8x128xf32> to vector<8x32xf32>
    %494 = arith.mulf %493, %479 : vector<8x32xf32>
    %495 = vector.extract_strided_slice %490 {offsets = [0, 0], sizes = [8, 32], strides = [1, 1]} : vector<8x128xf32> to vector<8x32xf32>
    %496 = arith.mulf %495, %492 : vector<8x32xf32>
    %497 = arith.addf %494, %496 : vector<8x32xf32>
    %498 = vector.extract_strided_slice %490 {offsets = [0, 96], sizes = [8, 32], strides = [1, 1]} : vector<8x128xf32> to vector<8x32xf32>
    %499 = math.tanh %497 : vector<8x32xf32>
    %500 = arith.mulf %498, %499 : vector<8x32xf32>
    %c0_115 = arith.constant 0 : index
    %c0_116 = arith.constant 0 : index
    %501 = vector.load %arg15[%c0_115, %c0_116] : memref<32x4xf32, #tpu.memory_space<vmem>>, vector<32x4xf32>
    %cst_117 = arith.constant dense<0.000000e+00> : vector<8x4xf32>
    %502 = tpu.matmul %500, %501, %cst_117 {dimension_numbers = #tpu.dot_dimension_numbers<[1], [0], [0], [1], [0, 0, 1, 1], [], []>} : vector<8x32xf32>, vector<32x4xf32>, vector<8x4xf32> -> vector<8x4xf32>
    %c0_118 = arith.constant 0 : index
    %c0_119 = arith.constant 0 : index
    %503 = vector.load %arg16[%c0_118, %c0_119] : memref<32x4xf32, #tpu.memory_space<vmem>>, vector<32x4xf32>
    %cst_120 = arith.constant dense<0.000000e+00> : vector<8x4xf32>
    %504 = tpu.matmul %374, %503, %cst_120 {dimension_numbers = #tpu.dot_dimension_numbers<[1], [0], [0], [1], [0, 0, 1, 1], [], []>} : vector<8x32xf32>, vector<32x4xf32>, vector<8x4xf32> -> vector<8x4xf32>
    %505 = arith.addf %502, %504 : vector<8x4xf32>
    %c0_121 = arith.constant 0 : index
    %c0_122 = arith.constant 0 : index
    %506 = vector.load %arg17[%c0_121, %c0_122] : memref<1x4xf32, #tpu.memory_space<vmem>>, vector<1x4xf32>
    %507 = vector.broadcast %506 : vector<1x4xf32> to vector<8x4xf32>
    %508 = arith.addf %505, %507 : vector<8x4xf32>
    %c0_123 = arith.constant 0 : index
    %c0_124 = arith.constant 0 : index
    %509 = vector.load %arg18[%c0_123, %c0_124] : memref<8x4xf32, #tpu.memory_space<vmem>>, vector<8x4xf32>
    tpu.vector_store %arg18[%c0_123, %c0_124], %508 {strides = array<i32>} : memref<8x4xf32, #tpu.memory_space<vmem>>, vector<8x4xf32>,
    return
  }
}

</mosaic_0001>

<bundles_post_ra>
// kernel: text_rnn_forward.1
= control target key start
LH: loop header
LB: loop body
LE: loop exit
PB: predicated region body
PF: predicated region fallthrough
CT: control target
= control target key end

     0   :  { %vm78_vm0 = vcmask 261120   ;;  %v4475_v8 = vmov 0.0   ;;  %vm4476_vm1 = vmmov 0   ;;  %vm3536_vm2 = vcmask 31744   ;;  %s5459_s4 = inlined_call_operand.vmem [shape: f32[32,128], index: 4, kind: input, shape index: {}]   ;;  %s5460_s0 = inlined_call_operand.vmem [shape: f32[64,32], index: 0, kind: input, shape index: {}]   ;;  %s5461_s5 = inlined_call_operand.vmem [shape: f32[32,128], index: 5, kind: input, shape index: {}]   ;;  %s5462_s6 = inlined_call_operand.vmem [shape: f32[1,128], index: 6, kind: input, shape index: {}]   ;;  %s5463_s1 = inlined_call_operand.vmem [shape: f32[32,128], index: 1, kind: input, shape index: {}]   ;;  %s5464_s2 = inlined_call_operand.vmem [shape: f32[32,128], index: 2, kind: input, shape index: {}]   ;;  %s5465_s3 = inlined_call_operand.vmem [shape: f32[1,128], index: 3, kind: input, shape index: {}]   ;;  %s5466_s7 = inlined_call_operand.vmem [shape: f32[32,128], index: 7, kind: input, shape index: {}]   ;;  %s5467_s8 = inlined_call_operand.vmem [shape: f32[32,128], index: 8, kind: input, shape index: {}]   ;;  %s5468_s12 = inlined_call_operand.vmem [shape: f32[32,128], index: 12, kind: input, shape index: {}]   ;;  %s5469_s9 = inlined_call_operand.vmem [shape: f32[32,128], index: 9, kind: input, shape index: {}]   ;;  %s5470_s10 = inlined_call_operand.vmem [shape: f32[1,128], index: 10, kind: input, shape index: {}]   ;;  %s5471_s11 = inlined_call_operand.vmem [shape: f32[32,128], index: 11, kind: input, shape index: {}]   ;;  %s5472_s13 = inlined_call_operand.vmem [shape: f32[32,128], index: 13, kind: input, shape index: {}]   ;;  %s5473_s14 = inlined_call_operand.vmem [shape: f32[1,128], index: 14, kind: input, shape index: {}]   ;;  %s5474_s16 = inlined_call_operand.vmem [shape: f32[32,4], index: 16, kind: input, shape index: {}]   ;;  %s5475_s15 = inlined_call_operand.vmem [shape: f32[32,4], index: 15, kind: input, shape index: {}]   ;;  %s5476_s17 = inlined_call_operand.vmem [shape: f32[1,4], index: 17, kind: input, shape index: {}]   ;;  %s5477_s18 = inlined_call_operand.vmem [shape: f32[8,4], index: 18, kind: output, shape index: {}]  }
   0x1   :  { %5481 = sst [smem:[#allocation4_spill]] %s5459_s4  ;;  %v3551_v17 = vld [vmem:[%s5462_s6] ss:$0 sm:$0xff]  ;;  %v70_v37 = vld [vmem:[%s5463_s1 + $0x18] sm:$0xff]  ;;  %v69_v38 = vld [vmem:[%s5463_s1 + $0x10] sm:$0xff] }
   0x2   :  { %5482 = sst [smem:[#allocation5_spill]] %s5460_s0  ;;  %3850 = vmatprep.subr.mxu0 %v70_v37  ;;  %v68_v39 = vld [vmem:[%s5463_s1 + $0x8] sm:$0xff]  ;;  %v67_v40 = vld [vmem:[%s5463_s1] sm:$0xff]  ;;  %v4714_v41 = vld [vmem:[%s5464_s2 + $0x18] sm:$0xff] }
   0x3   :  { %5483 = sst [smem:[#allocation6_spill]] %s5461_s5  ;;  %3851 = vmatpush3.msra.mxu0 %v70_v37  ;;  %v4726_v43 = vld [vmem:[%s5464_s2 + $0x10] sm:$0xff]  ;;  %v4734_v44 = vld [vmem:[%s5464_s2 + $0x8] sm:$0xff]  ;;  %v4743_v45 = vld [vmem:[%s5464_s2] sm:$0xff]  ;;  %s4478_s2 = smov 32  }
   0x4   :  { %s5484_s29 = sld [smem:[#allocation4_spill]]  ;;  %3852 = vmatprep.subr.mxu0 %v69_v38  ;;  %v3542_v53 = vld [vmem:[%s5465_s3] ss:$0 sm:$0xff] }
   0x5   :  { %s5485_s20 = sld [smem:[#allocation5_spill]]  ;;  %3853 = vmatpush3.msra.mxu0 %v69_v38 }
   0x6   :  { %s5486_s28 = sld [smem:[#allocation6_spill]]  ;;  %3854 = vmatprep.subr.mxu0 %v68_v39 }
   0x7   :  { %3855 = vmatpush3.msra.mxu0 %v68_v39 }
   0x8   :  { %3856 = vmatprep.subr.mxu0 %v67_v40 }
   0x9   :  { %3857 = vmatpush3.msra.mxu0 %v67_v40 }
   0xa   :  { %v211_v0 = vld [vmem:[%s5484_s29 + $0x18] sm:$0xff]  ;;  %v210_v1 = vld [vmem:[%s5484_s29 + $0x10] sm:$0xff]  ;;  %v209_v3 = vld [vmem:[%s5484_s29 + $0x8] sm:$0xff]  ;;  %3890 = vmatprep.subr.mxu0 %v4475_v8 }
   0xb   :  { %3870 = vmatprep.subr.mxu1 %v211_v0  ;;  %v59_v2 = vld [vmem:[%s5485_s20] sm:$0xff]  ;;  %v4594_v5 = vld [vmem:[%s5485_s20 + $0x8] sm:$0xff]  ;;  %v4604_v7 = vld [vmem:[%s5485_s20 + $0x10] sm:$0xff] }
   0xc   :  { %3871 = vmatpush3.msra.mxu1 %v211_v0  ;;  %3878 = vmatprep.mubr.msk.f32.mxu1 %vm78_vm0, %v59_v2  ;;  %v208_v4 = vld [vmem:[%s5484_s29] sm:$0xff]  ;;  %v4599_v6 = vld [vmem:[%s5486_s28 + $0x18] sm:$0xff]  ;;  %v4612_v9 = vld [vmem:[%s5486_s28 + $0x10] sm:$0xff]  ;;  %s4477_s29 = smov 64  }
   0xd   :  { %3872 = vmatprep.subr.mxu1 %v210_v1  ;;  %3858 = vmatprep.mubr.msk.f32.mxu0 %vm78_vm0, %v59_v2  ;;  %v4620_v10 = vld [vmem:[%s5485_s20 + $0x18] sm:$0xff]  ;;  %v4626_v11 = vld [vmem:[%s5485_s20 + $0x20] sm:$0xff]  ;;  %v4631_v12 = vld [vmem:[%s5486_s28 + $0x8] sm:$0xff] }
   0xe   :  { %3873 = vmatpush3.msra.mxu1 %v210_v1  ;;  %v4640_v13 = vld [vmem:[%s5486_s28] sm:$0xff]  ;;  %v4647_v14 = vld [vmem:[%s5485_s20 + $0x28] sm:$0xff]  ;;  %v4653_v15 = vld [vmem:[%s5485_s20 + $0x30] sm:$0xff]  ;;  %3859 = vmatmul.mubr.msk.f32.vlgmr.msra.gmra.mxu0 %vm78_vm0, %v4594_v5 }
   0xf   :  { %3874 = vmatprep.subr.mxu1 %v209_v3  ;;  %v4665_v16 = vld [vmem:[%s5485_s20 + $0x38] sm:$0xff]  ;;  %3861 = vmatprep.mubr.msk.f32.mxu0 %vm78_vm0, %v4604_v7 }
  0x10   :  { %3875 = vmatpush3.msra.mxu1 %v209_v3  ;;  %3891 = vmatpush3.msra.mxu0 %v4714_v41 }
  0x11   :  { %3876 = vmatprep.subr.mxu1 %v208_v4  ;;  %3892 = vmatprep.subr.mxu0 %v4475_v8 }
  0x12   :  { %3877 = vmatpush3.msra.mxu1 %v208_v4  ;;  %3862 = vmatmul.mubr.msk.f32.gmra.mxu0 %vm78_vm0, %v4620_v10 }
  0x13   :  { %3879 = vmatmul.mubr.msk.f32.vlgmr.msra.gmra.mxu1 %vm78_vm0, %v4594_v5  ;;  %3901 = vmatprep.subr.mxu1 %v4475_v8 }
  0x14   :  { %3902 = vmatpush3.msra.mxu1 %v4599_v6  ;;  %3881 = vmatprep.mubr.msk.f32.mxu1 %vm78_vm0, %v4604_v7 }
  0x15   :  { %3903 = vmatprep.subr.mxu1 %v4475_v8  ;;  %3864 = vmatprep.mubr.msk.f32.mxu0 %vm78_vm0, %v4626_v11 }
  0x16   :  { %3904 = vmatpush3.msra.mxu1 %v4612_v9  ;;  %3893 = vmatpush3.msra.mxu0 %v4726_v43 }
  0x17   :  { %3882 = vmatmul.mubr.msk.f32.gmra.mxu1 %vm78_vm0, %v4620_v10  ;;  %3905 = vmatprep.subr.mxu1 %v4475_v8 }
  0x18   :  { %3884 = vmatprep.mubr.msk.f32.mxu1 %vm78_vm0, %v4626_v11  ;;  %3906 = vmatpush3.msra.mxu1 %v4631_v12 }
  0x19   :  { %3907 = vmatprep.subr.mxu1 %v4475_v8  ;;  %3894 = vmatprep.subr.mxu0 %v4475_v8 }
  0x1a   :  { %3908 = vmatpush3.msra.mxu1 %v4640_v13  ;;  %3895 = vmatpush3.msra.mxu0 %v4734_v44 }
  0x1b   :  { %3885 = vmatmul.mubr.msk.f32.gmra.mxu1 %vm78_vm0, %v4647_v14  ;;  %3923 = vmatprep.subr.mxu1 %v4475_v8 }
  0x1c   :  { %3887 = vmatprep.mubr.msk.f32.mxu1 %vm78_vm0, %v4653_v15  ;;  %3865 = vmatmul.mubr.msk.f32.gmra.mxu0 %vm78_vm0, %v4647_v14 }
  0x1d   :  { %3896 = vmatprep.subr.mxu0 %v4475_v8  ;;  %3867 = vmatprep.mubr.msk.f32.mxu0 %vm78_vm0, %v4653_v15 }
  0x1e   :  { %3897 = vmatpush3.msra.mxu0 %v4743_v45 }
  0x1f   :  { %3888 = vmatmul.mubr.msk.f32.gmra.mxu1 %vm78_vm0, %v4665_v16  ;;  %3912 = vmatprep.subr.mxu0 %v4475_v8 }
  0x20   :  { %3909 = vmatprep.mubr.msk.f32.mxu1 %vm4476_vm1, %v4475_v8  ;;  %3868 = vmatmul.mubr.msk.f32.gmra.mxu0 %vm78_vm0, %v4665_v16 }
  0x21   :  { %3898 = vmatprep.mubr.msk.f32.mxu0 %vm4476_vm1, %v4475_v8 }
  0x23   :  { %3910 = vmatmul.mubr.f32.vlgmr.msra.gmra.mxu1 %v4475_v8 }
  0x24   :  { %3924 = vmatpush3.msra.mxu1 %v4599_v6  ;;  %3931 = vmatprep.mubr.msk.f32.mxu1 %vm4476_vm1, %v4475_v8 }
  0x25   :  { %3925 = vmatprep.subr.mxu1 %v4475_v8  ;;  %3899 = vmatmul.mubr.f32.vlgmr.msra.gmra.mxu0 %v4475_v8 }
  0x26   :  { %3926 = vmatpush3.msra.mxu1 %v4612_v9  ;;  %3913 = vmatpush3.msra.mxu0 %v4714_v41 }
  0x27   :  { %3927 = vmatprep.subr.mxu1 %v4475_v8  ;;  %3920 = vmatprep.mubr.msk.f32.mxu0 %vm4476_vm1, %v4475_v8 }
  0x28   :  { %3928 = vmatpush3.msra.mxu1 %v4631_v12  ;;  %3914 = vmatprep.subr.mxu0 %v4475_v8 }
  0x29   :  { %3929 = vmatprep.subr.mxu1 %v4475_v8  ;;  %3915 = vmatpush3.msra.mxu0 %v4726_v43 }
  0x2a   :  { %3930 = vmatpush3.msra.mxu1 %v4640_v13  ;;  %3916 = vmatprep.subr.mxu0 %v4475_v8 }
  0x2b   :  { %3945 = vmatprep.subr.mxu1 %v4475_v8  ;;  %3917 = vmatpush3.msra.mxu0 %v4734_v44 }
  0x2c   :  { %3918 = vmatprep.subr.mxu0 %v4475_v8 }
  0x2d   :  { %3919 = vmatpush3.msra.mxu0 %v4743_v45 }
  0x2e   :  { %3934 = vmatprep.subr.mxu0 %v4475_v8 }
  0xce   :  { %v3860_v52 = vpop.f32.mrf.mxu0 }
  0xcf   :  { %v4772_v54 = vadd.f32 %v3860_v52, %v3542_v53 }
  0xd0   :  { %v169_v55 = vpop.f32.mrf.mxu0 }
  0xd1   :  { %v170_v1 = vadd.f32 %v3542_v53, %v169_v55 }
  0xd2   :  { %v3863_v56 = vpop.f32.mrf.mxu0 }
  0xd3   :  { %v3880_v18 = vpop.f32.mrf.mxu1  ;;  %v4774_v57 = vadd.f32 %v3863_v56, %v3542_v53 }
  0xd4   :  { %v4685_v19 = vadd.f32 %v3880_v18, %v3551_v17  ;;  %v179_v58 = vpop.f32.mrf.mxu0 }
  0xd5   :  { %v285_v20 = vpop.f32.mrf.mxu1  ;;  %v4776_v59 = vadd.f32 %v3542_v53, %v179_v58 }
  0xd6   :  { %v4687_v21 = vadd.f32 %v3551_v17, %v285_v20 }
  0xd7   :  { %v3883_v22 = vpop.f32.mrf.mxu1 }
  0xd8   :  { %v4689_v23 = vadd.f32 %v3883_v22, %v3551_v17 }
  0xd9   :  { %v295_v24 = vpop.f32.mrf.mxu1 }
  0xda   :  { %v4691_v25 = vadd.f32 %v3551_v17, %v295_v24 }
  0xdb   :  { %v3886_v26 = vpop.f32.mrf.mxu1 }
  0xdc   :  { %v4693_v27 = vadd.f32 %v3886_v26, %v3551_v17  ;;  %v3866_v60 = vpop.f32.mrf.mxu0 }
  0xdd   :  { %v305_v28 = vpop.f32.mrf.mxu1  ;;  %v4778_v61 = vadd.f32 %v3866_v60, %v3542_v53 }
  0xde   :  { %v4695_v29 = vadd.f32 %v3551_v17, %v305_v28  ;;  %v189_v62 = vpop.f32.mrf.mxu0 }
  0xdf   :  { %v3889_v30 = vpop.f32.mrf.mxu1  ;;  %v4780_v63 = vadd.f32 %v3542_v53, %v189_v62 }
  0xe0   :  { %v321_v32 = vadd.f32 %v3889_v30, %v3551_v17  ;;  %v3869_v0 = vpop.f32.mrf.mxu0 }
  0xe1   :  { %v315_v31 = vpop.f32.mrf.mxu1  ;;  %v4782_v2 = vadd.f32 %v3869_v0, %v3542_v53 }
  0xe2   :  { %v4697_v33 = vadd.f32 %v3551_v17, %v315_v31  ;;  %v199_v3 = vpop.f32.mrf.mxu0 }
  0xe3   :  { %v472_v34 = vpop.f32.mrf.mxu1  ;;  %v4784_v4 = vadd.f32 %v3542_v53, %v199_v3 }
  0xe4   :  { %v476_v35 = vadd.f32 %v472_v34, %v321_v32 }
  0xe5   :  { %v3911_v36 = vpop.f32.mrf.mxu1  ;;  %v401_v5 = vpop.f32.mrf.mxu0 }
  0xe6   :  { %4271 = vtanh.f32 %v476_v35  ;;  %v3561_v46 = vmul.f32 -1.442695, %v476_v35  ;;  %v405_v7 = vadd.f32 %v401_v5, %v170_v1 }
  0xe7   :  { %v3900_v10 = vpop.f32.mrf.mxu0 }
  0xe8   :  { %4273 = vpow2.f32 %v3561_v46  ;;  %v3560_v22 = vmul.f32 -1.442695, %v405_v7 }
  0xf3   :  { %v4272_v42 = vpop.eup %4271 }
  0xf4   :  { %510 = vrot.lane.b32.xlu0 %v4272_v42, %s4477_s29 }
  0xf5   :  { %v4274_v47 = vpop.eup %4273 }
  0xf6   :  { %v504_v48 = vadd.f32 1.0, %v4274_v47 }
  0xf8   :  { %4275 = vrcp.f32 %v504_v48 }
 0x105   :  { %v4276_v49 = vpop.eup %4275 }
 0x106   :  { %v508_v11 = vmul.f32 0.0, %v4276_v49 }
 0x166   :  { %v511_v50 = vpop.permute.xlu0 %510 }
 0x167   :  { %v513_v51 = vmul.f32 %v4276_v49, %v511_v50 }
 0x169   :  { %515 = vrot.lane.b32.xlu0 %v513_v51, %s4478_s2 }
 0x1db   :  { %v516_v14 = vpop.permute.xlu0 %515 }
 0x1dc   :  { %v4786_v15 = vadd.f32 %v516_v14, %v508_v11 }
 0x1de   :  { %4277 = vtanh.f32 %v4786_v15 }
 0x1df   :  { %4279 = vtanh.f32 %v405_v7 }
 0x1e0   :  { %4281 = vpow2.f32 %v3560_v22 }
 0x1eb   :  { %v4278_v16 = vpop.eup %4277 }
 0x1ec   :  { %521 = vrot.lane.b32.xlu1 %v4278_v16, %s4477_s29  ;;  %v4280_v20 = vpop.eup %4279 }
 0x1ed   :  { %v4282_v24 = vpop.eup %4281 }
 0x1ee   :  { %v480_v26 = vadd.f32 1.0, %v4282_v24 }
 0x1f0   :  { %4283 = vrcp.f32 %v480_v26 }
 0x1fd   :  { %v4284_v30 = vpop.eup %4283 }
 0x1fe   :  { %v484_v34 = vmul.f32 0.0, %v4284_v30 }
 0x25e   :  { %v522_v17 = vpop.permute.xlu1 %521 }
 0x25f   :  { %v524_v18 = vmul.f32 %v4276_v49, %v522_v17 }
 0x261   :  { %531 = vrot.lane.b32.xlu1 %v524_v18, %s4478_s2 }
 0x265   :  { %486 = vrot.lane.b32.xlu1 %v4280_v20, %s4477_s29 }
 0x2d3   :  { %v532_v28 = vpop.permute.xlu1 %531 }
 0x2d4   :  { %534 = vst.msk [vmem:[#allocation3 + $0x38] sm:$0xff] %vm78_vm0, %v532_v28  ;;  %3932 = vmatmul.mubr.msk.f32.vlgmr.msra.gmra.mxu1 %vm78_vm0, %v532_v28 }
 0x2d5   :  { %3946 = vmatpush3.msra.mxu1 %v4599_v6  ;;  %3953 = vmatprep.mubr.msk.f32.mxu1 %vm4476_vm1, %v4475_v8 }
 0x2d6   :  { %3947 = vmatprep.subr.mxu1 %v4475_v8 }
 0x2d7   :  { %v487_v31 = vpop.permute.xlu1 %486  ;;  %3948 = vmatpush3.msra.mxu1 %v4612_v9 }
 0x2d8   :  { %v489_v32 = vmul.f32 %v4284_v30, %v487_v31  ;;  %3949 = vmatprep.subr.mxu1 %v4475_v8 }
 0x2d9   :  { %3950 = vmatpush3.msra.mxu1 %v4631_v12 }
 0x2da   :  { %491 = vrot.lane.b32.xlu1 %v489_v32, %s4478_s2  ;;  %3951 = vmatprep.subr.mxu1 %v4475_v8 }
 0x2db   :  { %3952 = vmatpush3.msra.mxu1 %v4640_v13 }
 0x2dc   :  { %3967 = vmatprep.subr.mxu1 %v4475_v8 }
 0x34c   :  { %v492_v35 = vpop.permute.xlu1 %491 }
 0x34d   :  { %v4805_v36 = vadd.f32 %v492_v35, %v484_v34 }
 0x34f   :  { %4285 = vtanh.f32 %v4805_v36 }
 0x35c   :  { %v4286_v37 = vpop.eup %4285 }
 0x35d   :  { %497 = vrot.lane.b32.xlu1 %v4286_v37, %s4477_s29 }
 0x394   :  { %v676_v38 = vpop.f32.mrf.mxu1 }
 0x395   :  { %v680_v39 = vadd.f32 %v676_v38, %v4697_v33 }
 0x396   :  { %v3933_v40 = vpop.f32.mrf.mxu1 }
 0x397   :  { %4287 = vtanh.f32 %v680_v39  ;;  %v3565_v48 = vmul.f32 -1.442695, %v680_v39 }
 0x399   :  { %4289 = vpow2.f32 %v3565_v48 }
 0x3a4   :  { %v4288_v42 = vpop.eup %4287 }
 0x3a5   :  { %714 = vrot.lane.b32.xlu0 %v4288_v42, %s4477_s29 }
 0x3a6   :  { %v4290_v49 = vpop.eup %4289 }
 0x3a7   :  { %v708_v50 = vadd.f32 1.0, %v4290_v49 }
 0x3a9   :  { %4291 = vrcp.f32 %v708_v50 }
 0x3b6   :  { %v4292_v51 = vpop.eup %4291 }
 0x3b7   :  { %v712_v55 = vmul.f32 %v4292_v51, %v4786_v15 }
 0x3cf   :  { %v498_v46 = vpop.permute.xlu1 %497 }
 0x3d0   :  { %v500_v47 = vmul.f32 %v4284_v30, %v498_v46 }
 0x3d2   :  { %526 = vrot.lane.b32.xlu1 %v500_v47, %s4478_s2 }
 0x417   :  { %v715_v52 = vpop.permute.xlu0 %714 }
 0x418   :  { %v717_v53 = vmul.f32 %v4292_v51, %v715_v52 }
 0x41a   :  { %719 = vrot.lane.b32.xlu0 %v717_v53, %s4478_s2 }
 0x444   :  { %v527_v33 = vpop.permute.xlu1 %526 }
 0x445   :  { %529 = vst.msk [vmem:[#allocation2] sm:$0xff] %vm78_vm0, %v527_v33  ;;  %3921 = vmatmul.mubr.msk.f32.vlgmr.msra.gmra.mxu0 %vm78_vm0, %v527_v33 }
 0x446   :  { %3935 = vmatpush3.msra.mxu0 %v4714_v41  ;;  %3942 = vmatprep.mubr.msk.f32.mxu0 %vm4476_vm1, %v4475_v8 }
 0x447   :  { %3936 = vmatprep.subr.mxu0 %v4475_v8 }
 0x448   :  { %3937 = vmatpush3.msra.mxu0 %v4726_v43 }
 0x449   :  { %3938 = vmatprep.subr.mxu0 %v4475_v8 }
 0x44a   :  { %3939 = vmatpush3.msra.mxu0 %v4734_v44 }
 0x44b   :  { %3940 = vmatprep.subr.mxu0 %v4475_v8 }
 0x44c   :  { %3941 = vmatpush3.msra.mxu0 %v4743_v45 }
 0x44d   :  { %3956 = vmatprep.subr.mxu0 %v4475_v8 }
 0x48c   :  { %v720_v56 = vpop.permute.xlu0 %719 }
 0x48d   :  { %v4826_v58 = vadd.f32 %v720_v56, %v712_v55 }
 0x48f   :  { %4293 = vtanh.f32 %v4826_v58 }
 0x49c   :  { %v4294_v60 = vpop.eup %4293 }
 0x49d   :  { %725 = vrot.lane.b32.xlu0 %v4294_v60, %s4477_s29 }
 0x505   :  { %v603_v62 = vpop.f32.mrf.mxu0 }
 0x506   :  { %v607_v0 = vadd.f32 %v603_v62, %v4772_v54 }
 0x507   :  { %v3922_v1 = vpop.f32.mrf.mxu0 }
 0x508   :  { %4295 = vtanh.f32 %v607_v0  ;;  %v3564_v10 = vmul.f32 -1.442695, %v607_v0 }
 0x50a   :  { %4297 = vpow2.f32 %v3564_v10 }
 0x50f   :  { %v726_v3 = vpop.permute.xlu0 %725 }
 0x510   :  { %v728_v5 = vmul.f32 %v4292_v51, %v726_v3 }
 0x512   :  { %735 = vrot.lane.b32.xlu0 %v728_v5, %s4478_s2 }
 0x515   :  { %v4296_v7 = vpop.eup %4295 }
 0x516   :  { %690 = vrot.lane.b32.xlu1 %v4296_v7, %s4477_s29 }
 0x517   :  { %v4298_v11 = vpop.eup %4297 }
 0x518   :  { %v684_v14 = vadd.f32 1.0, %v4298_v11 }
 0x51a   :  { %4299 = vrcp.f32 %v684_v14 }
 0x527   :  { %v4300_v54 = vpop.eup %4299 }
 0x528   :  { %v688_v18 = vmul.f32 %v4300_v54, %v4805_v36 }
 0x584   :  { %v736_v15 = vpop.permute.xlu0 %735 }
 0x585   :  { %738 = vst.msk [vmem:[#allocation3 + $0x30] sm:$0xff] %vm78_vm0, %v736_v15  ;;  %3954 = vmatmul.mubr.msk.f32.vlgmr.msra.gmra.mxu1 %vm78_vm0, %v736_v15 }
 0x586   :  { %3968 = vmatpush3.msra.mxu1 %v4599_v6  ;;  %3975 = vmatprep.mubr.msk.f32.mxu1 %vm4476_vm1, %v4475_v8 }
 0x587   :  { %3969 = vmatprep.subr.mxu1 %v4475_v8 }
 0x588   :  { %v691_v16 = vpop.permute.xlu1 %690  ;;  %3970 = vmatpush3.msra.mxu1 %v4612_v9 }
 0x589   :  { %v693_v17 = vmul.f32 %v4300_v54, %v691_v16  ;;  %3971 = vmatprep.subr.mxu1 %v4475_v8 }
 0x58a   :  { %3972 = vmatpush3.msra.mxu1 %v4631_v12 }
 0x58b   :  { %695 = vrot.lane.b32.xlu1 %v693_v17, %s4478_s2  ;;  %3973 = vmatprep.subr.mxu1 %v4475_v8 }
 0x58c   :  { %3974 = vmatpush3.msra.mxu1 %v4640_v13 }
 0x58d   :  { %3989 = vmatprep.subr.mxu1 %v4475_v8 }
 0x5fd   :  { %v696_v20 = vpop.permute.xlu1 %695 }
 0x5fe   :  { %v4847_v22 = vadd.f32 %v696_v20, %v688_v18 }
 0x600   :  { %4301 = vtanh.f32 %v4847_v22 }
 0x60d   :  { %v4302_v24 = vpop.eup %4301 }
 0x60e   :  { %701 = vrot.lane.b32.xlu1 %v4302_v24, %s4477_s29 }
 0x645   :  { %v880_v26 = vpop.f32.mrf.mxu1 }
 0x646   :  { %v884_v28 = vadd.f32 %v880_v26, %v4693_v27 }
 0x647   :  { %v3955_v30 = vpop.f32.mrf.mxu1 }
 0x648   :  { %4303 = vtanh.f32 %v884_v28  ;;  %v3569_v35 = vmul.f32 -1.442695, %v884_v28 }
 0x64a   :  { %4305 = vpow2.f32 %v3569_v35 }
 0x655   :  { %v4304_v31 = vpop.eup %4303 }
 0x656   :  { %918 = vrot.lane.b32.xlu0 %v4304_v31, %s4477_s29 }
 0x657   :  { %v4306_v36 = vpop.eup %4305 }
 0x658   :  { %v912_v37 = vadd.f32 1.0, %v4306_v36 }
 0x65a   :  { %4307 = vrcp.f32 %v912_v37 }
 0x667   :  { %v4308_v38 = vpop.eup %4307 }
 0x668   :  { %v916_v42 = vmul.f32 %v4308_v38, %v4826_v58 }
 0x680   :  { %v702_v32 = vpop.permute.xlu1 %701 }
 0x681   :  { %v704_v34 = vmul.f32 %v4300_v54, %v702_v32 }
 0x683   :  { %730 = vrot.lane.b32.xlu1 %v704_v34, %s4478_s2 }
 0x6c8   :  { %v919_v39 = vpop.permute.xlu0 %918 }
 0x6c9   :  { %v921_v40 = vmul.f32 %v4308_v38, %v919_v39 }
 0x6cb   :  { %923 = vrot.lane.b32.xlu0 %v921_v40, %s4478_s2 }
 0x6f5   :  { %v731_v27 = vpop.permute.xlu1 %730 }
 0x6f6   :  { %733 = vst.msk [vmem:[#allocation2 + $0x8] sm:$0xff] %vm78_vm0, %v731_v27  ;;  %3943 = vmatmul.mubr.msk.f32.vlgmr.msra.gmra.mxu0 %vm78_vm0, %v731_v27 }
 0x6f7   :  { %3957 = vmatpush3.msra.mxu0 %v4714_v41  ;;  %3964 = vmatprep.mubr.msk.f32.mxu0 %vm4476_vm1, %v4475_v8 }
 0x6f8   :  { %3958 = vmatprep.subr.mxu0 %v4475_v8 }
 0x6f9   :  { %3959 = vmatpush3.msra.mxu0 %v4726_v43 }
 0x6fa   :  { %3960 = vmatprep.subr.mxu0 %v4475_v8 }
 0x6fb   :  { %3961 = vmatpush3.msra.mxu0 %v4734_v44 }
 0x6fc   :  { %3962 = vmatprep.subr.mxu0 %v4475_v8 }
 0x6fd   :  { %3963 = vmatpush3.msra.mxu0 %v4743_v45 }
 0x6fe   :  { %3978 = vmatprep.subr.mxu0 %v4475_v8 }
 0x73d   :  { %v924_v46 = vpop.permute.xlu0 %923 }
 0x73e   :  { %v4868_v47 = vadd.f32 %v924_v46, %v916_v42 }
 0x740   :  { %4309 = vtanh.f32 %v4868_v47 }
 0x74d   :  { %v4310_v48 = vpop.eup %4309 }
 0x74e   :  { %929 = vrot.lane.b32.xlu0 %v4310_v48, %s4477_s29 }
 0x7b6   :  { %v807_v49 = vpop.f32.mrf.mxu0 }
 0x7b7   :  { %v811_v50 = vadd.f32 %v807_v49, %v4776_v59 }
 0x7b8   :  { %v3944_v51 = vpop.f32.mrf.mxu0 }
 0x7b9   :  { %4311 = vtanh.f32 %v811_v50  ;;  %v3568_v55 = vmul.f32 -1.442695, %v811_v50 }
 0x7bb   :  { %4313 = vpow2.f32 %v3568_v55 }
 0x7c0   :  { %v930_v52 = vpop.permute.xlu0 %929 }
 0x7c1   :  { %v932_v53 = vmul.f32 %v4308_v38, %v930_v52 }
 0x7c3   :  { %939 = vrot.lane.b32.xlu0 %v932_v53, %s4478_s2 }
 0x7c6   :  { %v4312_v33 = vpop.eup %4311 }
 0x7c7   :  { %894 = vrot.lane.b32.xlu1 %v4312_v33, %s4477_s29 }
 0x7c8   :  { %v4314_v56 = vpop.eup %4313 }
 0x7c9   :  { %v888_v58 = vadd.f32 1.0, %v4314_v56 }
 0x7cb   :  { %4315 = vrcp.f32 %v888_v58 }
 0x7d8   :  { %v4316_v59 = vpop.eup %4315 }
 0x7d9   :  { %v892_v1 = vmul.f32 %v4316_v59, %v4847_v22 }
 0x835   :  { %v940_v60 = vpop.permute.xlu0 %939 }
 0x836   :  { %942 = vst.msk [vmem:[#allocation3 + $0x28] sm:$0xff] %vm78_vm0, %v940_v60  ;;  %3976 = vmatmul.mubr.msk.f32.vlgmr.msra.gmra.mxu1 %vm78_vm0, %v940_v60 }
 0x837   :  { %3990 = vmatpush3.msra.mxu1 %v4599_v6  ;;  %3997 = vmatprep.mubr.msk.f32.mxu1 %vm4476_vm1, %v4475_v8 }
 0x838   :  { %3991 = vmatprep.subr.mxu1 %v4475_v8 }
 0x839   :  { %v895_v62 = vpop.permute.xlu1 %894  ;;  %3992 = vmatpush3.msra.mxu1 %v4612_v9 }
 0x83a   :  { %v897_v0 = vmul.f32 %v4316_v59, %v895_v62  ;;  %3993 = vmatprep.subr.mxu1 %v4475_v8 }
 0x83b   :  { %3994 = vmatpush3.msra.mxu1 %v4631_v12 }
 0x83c   :  { %899 = vrot.lane.b32.xlu1 %v897_v0, %s4478_s2  ;;  %3995 = vmatprep.subr.mxu1 %v4475_v8 }
 0x83d   :  { %3996 = vmatpush3.msra.mxu1 %v4640_v13 }
 0x83e   :  { %4011 = vmatprep.subr.mxu1 %v4475_v8 }
 0x8ae   :  { %v900_v3 = vpop.permute.xlu1 %899 }
 0x8af   :  { %v4889_v5 = vadd.f32 %v900_v3, %v892_v1 }
 0x8b1   :  { %4317 = vtanh.f32 %v4889_v5 }
 0x8be   :  { %v4318_v7 = vpop.eup %4317 }
 0x8bf   :  { %905 = vrot.lane.b32.xlu1 %v4318_v7, %s4477_s29 }
 0x8f6   :  { %v1084_v10 = vpop.f32.mrf.mxu1 }
 0x8f7   :  { %v1088_v11 = vadd.f32 %v1084_v10, %v4695_v29 }
 0x8f8   :  { %v3977_v14 = vpop.f32.mrf.mxu1 }
 0x8f9   :  { %4319 = vtanh.f32 %v1088_v11  ;;  %v3573_v17 = vmul.f32 -1.442695, %v1088_v11 }
 0x8fb   :  { %4321 = vpow2.f32 %v3573_v17 }
 0x906   :  { %v4320_v15 = vpop.eup %4319 }
 0x907   :  { %1122 = vrot.lane.b32.xlu0 %v4320_v15, %s4477_s29 }
 0x908   :  { %v4322_v18 = vpop.eup %4321 }
 0x909   :  { %v1116_v20 = vadd.f32 1.0, %v4322_v18 }
 0x90b   :  { %4323 = vrcp.f32 %v1116_v20 }
 0x918   :  { %v4324_v22 = vpop.eup %4323 }
 0x919   :  { %v1120_v28 = vmul.f32 %v4324_v22, %v4868_v47 }
 0x931   :  { %v906_v54 = vpop.permute.xlu1 %905 }
 0x932   :  { %v908_v16 = vmul.f32 %v4316_v59, %v906_v54 }
 0x934   :  { %934 = vrot.lane.b32.xlu1 %v908_v16, %s4478_s2 }
 0x979   :  { %v1123_v24 = vpop.permute.xlu0 %1122 }
 0x97a   :  { %v1125_v26 = vmul.f32 %v4324_v22, %v1123_v24 }
 0x97c   :  { %1127 = vrot.lane.b32.xlu0 %v1125_v26, %s4478_s2 }
 0x9a6   :  { %v935_v29 = vpop.permute.xlu1 %934 }
 0x9a7   :  { %937 = vst.msk [vmem:[#allocation2 + $0x10] sm:$0xff] %vm78_vm0, %v935_v29  ;;  %3965 = vmatmul.mubr.msk.f32.vlgmr.msra.gmra.mxu0 %vm78_vm0, %v935_v29 }
 0x9a8   :  { %3979 = vmatpush3.msra.mxu0 %v4714_v41  ;;  %3986 = vmatprep.mubr.msk.f32.mxu0 %vm4476_vm1, %v4475_v8 }
 0x9a9   :  { %3980 = vmatprep.subr.mxu0 %v4475_v8 }
 0x9aa   :  { %3981 = vmatpush3.msra.mxu0 %v4726_v43 }
 0x9ab   :  { %3982 = vmatprep.subr.mxu0 %v4475_v8 }
 0x9ac   :  { %3983 = vmatpush3.msra.mxu0 %v4734_v44 }
 0x9ad   :  { %3984 = vmatprep.subr.mxu0 %v4475_v8 }
 0x9ae   :  { %3985 = vmatpush3.msra.mxu0 %v4743_v45 }
 0x9af   :  { %4000 = vmatprep.subr.mxu0 %v4475_v8 }
 0x9ee   :  { %v1128_v30 = vpop.permute.xlu0 %1127 }
 0x9ef   :  { %v4910_v31 = vadd.f32 %v1128_v30, %v1120_v28 }
 0x9f1   :  { %4325 = vtanh.f32 %v4910_v31 }
 0x9fe   :  { %v4326_v32 = vpop.eup %4325 }
 0x9ff   :  { %1133 = vrot.lane.b32.xlu0 %v4326_v32, %s4477_s29 }
 0xa67   :  { %v1011_v34 = vpop.f32.mrf.mxu0 }
 0xa68   :  { %v1015_v35 = vadd.f32 %v1011_v34, %v4774_v57 }
 0xa69   :  { %v3966_v36 = vpop.f32.mrf.mxu0 }
 0xa6a   :  { %4327 = vtanh.f32 %v1015_v35  ;;  %v3572_v40 = vmul.f32 -1.442695, %v1015_v35 }
 0xa6c   :  { %4329 = vpow2.f32 %v3572_v40 }
 0xa71   :  { %v1134_v37 = vpop.permute.xlu0 %1133 }
 0xa72   :  { %v1136_v38 = vmul.f32 %v4324_v22, %v1134_v37 }
 0xa74   :  { %1143 = vrot.lane.b32.xlu0 %v1136_v38, %s4478_s2 }
 0xa77   :  { %v4328_v39 = vpop.eup %4327 }
 0xa78   :  { %1098 = vrot.lane.b32.xlu1 %v4328_v39, %s4477_s29 }
 0xa79   :  { %v4330_v27 = vpop.eup %4329 }
 0xa7a   :  { %v1092_v42 = vadd.f32 1.0, %v4330_v27 }
 0xa7c   :  { %4331 = vrcp.f32 %v1092_v42 }
 0xa89   :  { %v4332_v57 = vpop.eup %4331 }
 0xa8a   :  { %v1096_v49 = vmul.f32 %v4332_v57, %v4889_v5 }
 0xae6   :  { %v1144_v46 = vpop.permute.xlu0 %1143 }
 0xae7   :  { %1146 = vst.msk [vmem:[#allocation3 + $0x20] sm:$0xff] %vm78_vm0, %v1144_v46  ;;  %3998 = vmatmul.mubr.msk.f32.vlgmr.msra.gmra.mxu1 %vm78_vm0, %v1144_v46 }
 0xae8   :  { %4012 = vmatpush3.msra.mxu1 %v4599_v6  ;;  %4019 = vmatprep.mubr.msk.f32.mxu1 %vm4476_vm1, %v4475_v8 }
 0xae9   :  { %4013 = vmatprep.subr.mxu1 %v4475_v8 }
 0xaea   :  { %v1099_v47 = vpop.permute.xlu1 %1098  ;;  %4014 = vmatpush3.msra.mxu1 %v4612_v9 }
 0xaeb   :  { %v1101_v48 = vmul.f32 %v4332_v57, %v1099_v47  ;;  %4015 = vmatprep.subr.mxu1 %v4475_v8 }
 0xaec   :  { %4016 = vmatpush3.msra.mxu1 %v4631_v12 }
 0xaed   :  { %1103 = vrot.lane.b32.xlu1 %v1101_v48, %s4478_s2  ;;  %4017 = vmatprep.subr.mxu1 %v4475_v8 }
 0xaee   :  { %4018 = vmatpush3.msra.mxu1 %v4640_v13 }
 0xaef   :  { %4033 = vmatprep.subr.mxu1 %v4475_v8 }
 0xb5f   :  { %v1104_v50 = vpop.permute.xlu1 %1103 }
 0xb60   :  { %v4931_v51 = vadd.f32 %v1104_v50, %v1096_v49 }
 0xb62   :  { %4333 = vtanh.f32 %v4931_v51 }
 0xb6f   :  { %v4334_v52 = vpop.eup %4333 }
 0xb70   :  { %1109 = vrot.lane.b32.xlu1 %v4334_v52, %s4477_s29 }
 0xba7   :  { %v1288_v53 = vpop.f32.mrf.mxu1 }
 0xba8   :  { %v1292_v33 = vadd.f32 %v1288_v53, %v4689_v23 }
 0xba9   :  { %v3999_v55 = vpop.f32.mrf.mxu1 }
 0xbaa   :  { %4335 = vtanh.f32 %v1292_v33  ;;  %v3577_v59 = vmul.f32 -1.442695, %v1292_v33 }
 0xbac   :  { %4337 = vpow2.f32 %v3577_v59 }
 0xbb7   :  { %v4336_v56 = vpop.eup %4335 }
 0xbb8   :  { %1326 = vrot.lane.b32.xlu0 %v4336_v56, %s4477_s29 }
 0xbb9   :  { %v4338_v62 = vpop.eup %4337 }
 0xbba   :  { %v1320_v0 = vadd.f32 1.0, %v4338_v62 }
 0xbbc   :  { %4339 = vrcp.f32 %v1320_v0 }
 0xbc9   :  { %v4340_v1 = vpop.eup %4339 }
 0xbca   :  { %v1324_v7 = vmul.f32 %v4340_v1, %v4910_v31 }
 0xbe2   :  { %v1110_v58 = vpop.permute.xlu1 %1109 }
 0xbe3   :  { %v1112_v60 = vmul.f32 %v4332_v57, %v1110_v58 }
 0xbe5   :  { %1138 = vrot.lane.b32.xlu1 %v1112_v60, %s4478_s2 }
 0xc2a   :  { %v1327_v3 = vpop.permute.xlu0 %1326 }
 0xc2b   :  { %v1329_v5 = vmul.f32 %v4340_v1, %v1327_v3 }
 0xc2d   :  { %1331 = vrot.lane.b32.xlu0 %v1329_v5, %s4478_s2  ;;  %v4473_v5 = vld [vmem:[%s5486_s28 + $0x8] sm:$0xff] }
 0xc57   :  { %v1139_v23 = vpop.permute.xlu1 %1138 }
 0xc58   :  { %1141 = vst.msk [vmem:[#allocation2 + $0x18] sm:$0xff] %vm78_vm0, %v1139_v23  ;;  %3987 = vmatmul.mubr.msk.f32.vlgmr.msra.gmra.mxu0 %vm78_vm0, %v1139_v23  ;;  %v4474_v23 = vld [vmem:[%s5486_s28] sm:$0xff] }
 0xc59   :  { %4001 = vmatpush3.msra.mxu0 %v4714_v41  ;;  %4008 = vmatprep.mubr.msk.f32.mxu0 %vm4476_vm1, %v4475_v8 }
 0xc5a   :  { %4002 = vmatprep.subr.mxu0 %v4475_v8 }
 0xc5b   :  { %4003 = vmatpush3.msra.mxu0 %v4726_v43 }
 0xc5c   :  { %4004 = vmatprep.subr.mxu0 %v4475_v8 }
 0xc5d   :  { %4005 = vmatpush3.msra.mxu0 %v4734_v44 }
 0xc5e   :  { %4006 = vmatprep.subr.mxu0 %v4475_v8 }
 0xc5f   :  { %4007 = vmatpush3.msra.mxu0 %v4743_v45 }
 0xc60   :  { %4022 = vmatprep.subr.mxu0 %v4475_v8 }
 0xc9f   :  { %v1332_v10 = vpop.permute.xlu0 %1331 }
 0xca0   :  { %v4952_v11 = vadd.f32 %v1332_v10, %v1324_v7 }
 0xca2   :  { %4341 = vtanh.f32 %v4952_v11 }
 0xcaf   :  { %v4342_v14 = vpop.eup %4341 }
 0xcb0   :  { %1337 = vrot.lane.b32.xlu0 %v4342_v14, %s4477_s29 }
 0xd18   :  { %v1215_v15 = vpop.f32.mrf.mxu0 }
 0xd19   :  { %v1219_v54 = vadd.f32 %v1215_v15, %v4780_v63 }
 0xd1a   :  { %v3988_v16 = vpop.f32.mrf.mxu0 }
 0xd1b   :  { %4343 = vtanh.f32 %v1219_v54  ;;  %v3576_v22 = vmul.f32 -1.442695, %v1219_v54 }
 0xd1d   :  { %4345 = vpow2.f32 %v3576_v22 }
 0xd22   :  { %v1338_v17 = vpop.permute.xlu0 %1337 }
 0xd23   :  { %v1340_v18 = vmul.f32 %v4340_v1, %v1338_v17  ;;  %v4472_v1 = vld [vmem:[%s5486_s28 + $0x10] sm:$0xff] }
 0xd25   :  { %1347 = vrot.lane.b32.xlu0 %v1340_v18, %s4478_s2 }
 0xd28   :  { %v4344_v20 = vpop.eup %4343 }
 0xd29   :  { %1302 = vrot.lane.b32.xlu1 %v4344_v20, %s4477_s29 }
 0xd2a   :  { %v4346_v24 = vpop.eup %4345 }
 0xd2b   :  { %v1296_v26 = vadd.f32 1.0, %v4346_v24 }
 0xd2d   :  { %4347 = vrcp.f32 %v1296_v26 }
 0xd3a   :  { %v4348_v63 = vpop.eup %4347 }
 0xd97   :  { %v1348_v29 = vpop.permute.xlu0 %1347 }
 0xd98   :  { %1350 = vst.msk [vmem:[#allocation3 + $0x18] sm:$0xff] %vm78_vm0, %v1348_v29  ;;  %4020 = vmatmul.mubr.msk.f32.vlgmr.msra.gmra.mxu1 %vm78_vm0, %v1348_v29 }
 0xd99   :  { %4034 = vmatpush3.msra.mxu1 %v4599_v6  ;;  %4041 = vmatprep.mubr.msk.f32.mxu1 %vm4476_vm1, %v4475_v8  ;;  %v1300_v6 = vmul.f32 %v4348_v63, %v4931_v51 }
 0xd9a   :  { %4035 = vmatprep.subr.mxu1 %v4475_v8 }
 0xd9b   :  { %v1303_v28 = vpop.permute.xlu1 %1302  ;;  %4036 = vmatpush3.msra.mxu1 %v4612_v9 }
 0xd9c   :  { %v1305_v30 = vmul.f32 %v4348_v63, %v1303_v28  ;;  %4037 = vmatprep.subr.mxu1 %v4475_v8 }
 0xd9d   :  { %4038 = vmatpush3.msra.mxu1 %v4631_v12 }
 0xd9e   :  { %1307 = vrot.lane.b32.xlu1 %v1305_v30, %s4478_s2  ;;  %4039 = vmatprep.subr.mxu1 %v4475_v8 }
 0xd9f   :  { %4040 = vmatpush3.msra.mxu1 %v4640_v13 }
 0xda0   :  { %4055 = vmatprep.subr.mxu1 %v4475_v8 }
 0xe10   :  { %v1308_v31 = vpop.permute.xlu1 %1307 }
 0xe11   :  { %v4973_v32 = vadd.f32 %v1308_v31, %v1300_v6 }
 0xe13   :  { %4349 = vtanh.f32 %v4973_v32 }
 0xe20   :  { %v4350_v9 = vpop.eup %4349 }
 0xe21   :  { %1313 = vrot.lane.b32.xlu1 %v4350_v9, %s4477_s29 }
 0xe58   :  { %v1492_v34 = vpop.f32.mrf.mxu1 }
 0xe59   :  { %v1496_v12 = vadd.f32 %v1492_v34, %v4691_v25 }
 0xe5a   :  { %v4021_v35 = vpop.f32.mrf.mxu1 }
 0xe5b   :  { %4351 = vtanh.f32 %v1496_v12  ;;  %v3581_v38 = vmul.f32 -1.442695, %v1496_v12 }
 0xe5d   :  { %4353 = vpow2.f32 %v3581_v38  ;;  %v1981_v38 = vld [vmem:[%s5466_s7 + $0x10] sm:$0xff] }
 0xe68   :  { %v4352_v36 = vpop.eup %4351 }
 0xe69   :  { %1530 = vrot.lane.b32.xlu0 %v4352_v36, %s4477_s29 }
 0xe6a   :  { %v4354_v39 = vpop.eup %4353 }
 0xe6b   :  { %v1524_v40 = vadd.f32 1.0, %v4354_v39  ;;  %v1980_v39 = vld [vmem:[%s5466_s7 + $0x8] sm:$0xff] }
 0xe6d   :  { %4355 = vrcp.f32 %v1524_v40 }
 0xe7a   :  { %v4356_v27 = vpop.eup %4355 }
 0xe7b   :  { %v1528_v57 = vmul.f32 %v4356_v27, %v4952_v11 }
 0xe93   :  { %v1314_v13 = vpop.permute.xlu1 %1313 }
 0xe94   :  { %v1316_v37 = vmul.f32 %v4348_v63, %v1314_v13 }
 0xe96   :  { %1342 = vrot.lane.b32.xlu1 %v1316_v37, %s4478_s2 }
 0xedb   :  { %v1531_v42 = vpop.permute.xlu0 %1530 }
 0xedc   :  { %v1533_v46 = vmul.f32 %v4356_v27, %v1531_v42  ;;  %v1979_v42 = vld [vmem:[%s5466_s7] sm:$0xff] }
 0xede   :  { %1535 = vrot.lane.b32.xlu0 %v1533_v46, %s4478_s2 }
 0xf08   :  { %v1343_v25 = vpop.permute.xlu1 %1342 }
 0xf09   :  { %1345 = vst.msk [vmem:[#allocation2 + $0x20] sm:$0xff] %vm78_vm0, %v1343_v25  ;;  %4009 = vmatmul.mubr.msk.f32.vlgmr.msra.gmra.mxu0 %vm78_vm0, %v1343_v25  ;;  %v5068_v25 = vld [vmem:[#allocation2 + $0x8] sm:$0xff] }
 0xf0a   :  { %4023 = vmatpush3.msra.mxu0 %v4714_v41  ;;  %4030 = vmatprep.mubr.msk.f32.mxu0 %vm4476_vm1, %v4475_v8 }
 0xf0b   :  { %4024 = vmatprep.subr.mxu0 %v4475_v8 }
 0xf0c   :  { %4025 = vmatpush3.msra.mxu0 %v4726_v43 }
 0xf0d   :  { %4026 = vmatprep.subr.mxu0 %v4475_v8 }
 0xf0e   :  { %4027 = vmatpush3.msra.mxu0 %v4734_v44 }
 0xf0f   :  { %4028 = vmatprep.subr.mxu0 %v4475_v8 }
 0xf10   :  { %4029 = vmatpush3.msra.mxu0 %v4743_v45 }
 0xf11   :  { %4044 = vmatprep.subr.mxu0 %v4475_v8 }
 0xf50   :  { %v1536_v47 = vpop.permute.xlu0 %1535 }
 0xf51   :  { %v4994_v48 = vadd.f32 %v1536_v47, %v1528_v57  ;;  %v5072_v57 = vld [vmem:[#allocation2 + $0x10] sm:$0xff]  ;;  %v5076_v47 = vld [vmem:[#allocation2 + $0x18] sm:$0xff] }
 0xf53   :  { %4357 = vtanh.f32 %v4994_v48 }
 0xf60   :  { %v4358_v49 = vpop.eup %4357 }
 0xf61   :  { %1541 = vrot.lane.b32.xlu0 %v4358_v49, %s4477_s29 }
 0xfc9   :  { %v1419_v50 = vpop.f32.mrf.mxu0 }
 0xfca   :  { %v1423_v51 = vadd.f32 %v1419_v50, %v4778_v61  ;;  %v4471_v61 = vld [vmem:[%s5486_s28 + $0x18] sm:$0xff] }
 0xfcb   :  { %v4010_v52 = vpop.f32.mrf.mxu0 }
 0xfcc   :  { %4359 = vtanh.f32 %v1423_v51  ;;  %v3580_v56 = vmul.f32 -1.442695, %v1423_v51 }
 0xfce   :  { %4361 = vpow2.f32 %v3580_v56 }
 0xfd3   :  { %v1542_v53 = vpop.permute.xlu0 %1541 }
 0xfd4   :  { %v1544_v33 = vmul.f32 %v4356_v27, %v1542_v53 }
 0xfd6   :  { %1551 = vrot.lane.b32.xlu0 %v1544_v33, %s4478_s2 }
 0xfd9   :  { %v4360_v55 = vpop.eup %4359 }
 0xfda   :  { %1506 = vrot.lane.b32.xlu1 %v4360_v55, %s4477_s29 }
 0xfdb   :  { %v4362_v58 = vpop.eup %4361 }
 0xfdc   :  { %v1500_v60 = vadd.f32 1.0, %v4362_v58 }
 0xfde   :  { %4363 = vrcp.f32 %v1500_v60 }
 0xfeb   :  { %v4364_v62 = vpop.eup %4363 }
 0xfec   :  { %v1504_v7 = vmul.f32 %v4364_v62, %v4973_v32 }
0x1048   :  { %v1552_v59 = vpop.permute.xlu0 %1551 }
0x1049   :  { %1554 = vst.msk [vmem:[#allocation3 + $0x10] sm:$0xff] %vm78_vm0, %v1552_v59  ;;  %4042 = vmatmul.mubr.msk.f32.vlgmr.msra.gmra.mxu1 %vm78_vm0, %v1552_v59 }
0x104a   :  { %4056 = vmatpush3.msra.mxu1 %v4471_v61  ;;  %4063 = vmatprep.mubr.msk.f32.mxu1 %vm4476_vm1, %v4475_v8 }
0x104b   :  { %4057 = vmatprep.subr.mxu1 %v4475_v8 }
0x104c   :  { %v1507_v0 = vpop.permute.xlu1 %1506  ;;  %4058 = vmatpush3.msra.mxu1 %v4472_v1 }
0x104d   :  { %v1509_v3 = vmul.f32 %v4364_v62, %v1507_v0  ;;  %4059 = vmatprep.subr.mxu1 %v4475_v8 }
0x104e   :  { %4060 = vmatpush3.msra.mxu1 %v4473_v5 }
0x104f   :  { %1511 = vrot.lane.b32.xlu1 %v1509_v3, %s4478_s2  ;;  %4061 = vmatprep.subr.mxu1 %v4475_v8 }
0x1050   :  { %4062 = vmatpush3.msra.mxu1 %v4474_v23 }
0x10c1   :  { %v1512_v10 = vpop.permute.xlu1 %1511 }
0x10c2   :  { %v5022_v11 = vadd.f32 %v1512_v10, %v1504_v7 }
0x10c4   :  { %4365 = vtanh.f32 %v5022_v11 }
0x10d1   :  { %v4366_v14 = vpop.eup %4365 }
0x10d2   :  { %1517 = vrot.lane.b32.xlu1 %v4366_v14, %s4477_s29 }
0x1109   :  { %v1696_v15 = vpop.f32.mrf.mxu1 }
0x110a   :  { %v1700_v54 = vadd.f32 %v1696_v15, %v4685_v19 }
0x110b   :  { %v4043_v16 = vpop.f32.mrf.mxu1 }
0x110c   :  { %4367 = vtanh.f32 %v1700_v54  ;;  %v3585_v22 = vmul.f32 -1.442695, %v1700_v54  ;;  %v1986_v16 = vld [vmem:[%s5467_s8 + $0x18] sm:$0xff] }
0x110e   :  { %4369 = vpow2.f32 %v3585_v22 }
0x1119   :  { %v4368_v17 = vpop.eup %4367 }
0x111a   :  { %1734 = vrot.lane.b32.xlu0 %v4368_v17, %s4477_s29  ;;  %v1985_v17 = vld [vmem:[%s5467_s8 + $0x10] sm:$0xff] }
0x111b   :  { %v4370_v24 = vpop.eup %4369 }
0x111c   :  { %v1728_v26 = vadd.f32 1.0, %v4370_v24  ;;  %v2267_v24 = vld [vmem:[%s5468_s12 + $0x18] sm:$0xff] }
0x111e   :  { %4371 = vrcp.f32 %v1728_v26 }
0x112b   :  { %v4372_v29 = vpop.eup %4371 }
0x112c   :  { %v1732_v30 = vmul.f32 %v4372_v29, %v4994_v48  ;;  %v5080_v48 = vld [vmem:[#allocation2 + $0x20] sm:$0xff] }
0x1144   :  { %v1518_v18 = vpop.permute.xlu1 %1517 }
0x1145   :  { %v1520_v20 = vmul.f32 %v4364_v62, %v1518_v18 }
0x1147   :  { %1546 = vrot.lane.b32.xlu1 %v1520_v20, %s4478_s2  ;;  %v1984_v20 = vld [vmem:[%s5467_s8 + $0x8] sm:$0xff] }
0x118c   :  { %v1735_v63 = vpop.permute.xlu0 %1734 }
0x118d   :  { %v1737_v28 = vmul.f32 %v4372_v29, %v1735_v63 }
0x118f   :  { %1739 = vrot.lane.b32.xlu0 %v1737_v28, %s4478_s2 }
0x11b9   :  { %v1547_v19 = vpop.permute.xlu1 %1546 }
0x11ba   :  { %1549 = vst.msk [vmem:[#allocation2 + $0x28] sm:$0xff] %vm78_vm0, %v1547_v19  ;;  %4031 = vmatmul.mubr.msk.f32.vlgmr.msra.gmra.mxu0 %vm78_vm0, %v1547_v19  ;;  %v2266_v19 = vld [vmem:[%s5468_s12 + $0x10] sm:$0xff] }
0x11bb   :  { %4045 = vmatpush3.msra.mxu0 %v4714_v41  ;;  %4052 = vmatprep.mubr.msk.f32.mxu0 %vm4476_vm1, %v4475_v8  ;;  %v1982_v41 = vld [vmem:[%s5466_s7 + $0x18] sm:$0xff] }
0x11bc   :  { %4046 = vmatprep.subr.mxu0 %v4475_v8  ;;  %4086 = vmatprep.subr.mxu1 %v1982_v41 }
0x11bd   :  { %4047 = vmatpush3.msra.mxu0 %v4726_v43 }
0x11be   :  { %4048 = vmatprep.subr.mxu0 %v4475_v8 }
0x11bf   :  { %4049 = vmatpush3.msra.mxu0 %v4734_v44 }
0x11c0   :  { %4050 = vmatprep.subr.mxu0 %v4475_v8 }
0x11c1   :  { %4051 = vmatpush3.msra.mxu0 %v4743_v45  ;;  %v5084_v49 = vld [vmem:[#allocation2 + $0x28] sm:$0xff] }
0x11c2   :  { %4066 = vmatprep.subr.mxu0 %v1986_v16 }
0x1201   :  { %v1740_v6 = vpop.permute.xlu0 %1739 }
0x1202   :  { %v5042_v31 = vadd.f32 %v1740_v6, %v1732_v30  ;;  %v1973_v30 = vld [vmem:[#allocation3 + $0x10] sm:$0xff]  ;;  %v2265_v6 = vld [vmem:[%s5468_s12 + $0x8] sm:$0xff] }
0x1204   :  { %4373 = vtanh.f32 %v5042_v31 }
0x1211   :  { %v4374_v43 = vpop.eup %4373 }
0x1212   :  { %1745 = vrot.lane.b32.xlu0 %v4374_v43, %s4477_s29  ;;  %v1975_v43 = vld [vmem:[#allocation3 + $0x20] sm:$0xff] }
0x127a   :  { %v1623_v44 = vpop.f32.mrf.mxu0 }
0x127b   :  { %v1627_v32 = vadd.f32 %v1623_v44, %v4784_v4  ;;  %v5057_v4 = vld [vmem:[#allocation2] sm:$0xff]  ;;  %v1976_v44 = vld [vmem:[#allocation3 + $0x28] sm:$0xff] }
0x127c   :  { %v4032_v9 = vpop.f32.mrf.mxu0 }
0x127d   :  { %4375 = vtanh.f32 %v1627_v32  ;;  %v3584_v35 = vmul.f32 -1.442695, %v1627_v32  ;;  %v1977_v32 = vld [vmem:[#allocation3 + $0x30] sm:$0xff]  ;;  %v1978_v9 = vld [vmem:[#allocation3 + $0x38] sm:$0xff] }
0x127f   :  { %4377 = vpow2.f32 %v3584_v35  ;;  %v5169_v35 = vld [vmem:[%s5469_s9] sm:$0xff] }
0x1284   :  { %v1746_v45 = vpop.permute.xlu0 %1745 }
0x1285   :  { %v1748_v34 = vmul.f32 %v4372_v29, %v1746_v45  ;;  %v5147_v45 = vld [vmem:[%s5469_s9 + $0x18] sm:$0xff] }
0x1287   :  { %1755 = vrot.lane.b32.xlu0 %v1748_v34, %s4478_s2  ;;  %v5153_v34 = vld [vmem:[%s5469_s9 + $0x10] sm:$0xff] }
0x128a   :  { %v4376_v12 = vpop.eup %4375 }
0x128b   :  { %1710 = vrot.lane.b32.xlu1 %v4376_v12, %s4477_s29  ;;  %v5161_v12 = vld [vmem:[%s5469_s9 + $0x8] sm:$0xff] }
0x128c   :  { %v4378_v36 = vpop.eup %4377 }
0x128d   :  { %v1704_v13 = vadd.f32 1.0, %v4378_v36 }
0x128f   :  { %4379 = vrcp.f32 %v1704_v13 }
0x129c   :  { %v4380_v40 = vpop.eup %4379 }
0x129d   :  { %v1708_v50 = vmul.f32 %v4380_v40, %v5022_v11 }
0x12f9   :  { %v1756_v37 = vpop.permute.xlu0 %1755 }
0x12fa   :  { %1758 = vst.msk [vmem:[#allocation3 + $0x8] sm:$0xff] %vm78_vm0, %v1756_v37  ;;  %4064 = vmatmul.mubr.msk.f32.vlgmr.msra.gmra.mxu1 %vm78_vm0, %v1756_v37 }
0x12fb   :  { %4087 = vmatpush3.msra.mxu1 %v1982_v41  ;;  %4094 = vmatprep.mubr.msk.f32.mxu1 %vm78_vm0, %v5057_v4  ;;  %v2264_v41 = vld [vmem:[%s5468_s12] sm:$0xff] }
0x12fc   :  { %4088 = vmatprep.subr.mxu1 %v1981_v38 }
0x12fd   :  { %4089 = vmatpush3.msra.mxu1 %v1981_v38  ;;  %v1711_v27 = vpop.permute.xlu1 %1710 }
0x12fe   :  { %4090 = vmatprep.subr.mxu1 %v1980_v39  ;;  %v1713_v46 = vmul.f32 %v4380_v40, %v1711_v27 }
0x12ff   :  { %4091 = vmatpush3.msra.mxu1 %v1980_v39 }
0x1300   :  { %4092 = vmatprep.subr.mxu1 %v1979_v42  ;;  %1715 = vrot.lane.b32.xlu1 %v1713_v46, %s4478_s2 }
0x1301   :  { %4093 = vmatpush3.msra.mxu1 %v1979_v42  ;;  %v1972_v28 = vld [vmem:[#allocation3 + $0x8] sm:$0xff] }
0x1302   :  { %4095 = vmatmul.mubr.msk.f32.vlgmr.msra.gmra.mxu1 %vm78_vm0, %v5068_v25 }
0x1303   :  { %4097 = vmatprep.mubr.msk.f32.mxu1 %vm78_vm0, %v5072_v57 }
0x1306   :  { %4098 = vmatmul.mubr.msk.f32.gmra.mxu1 %vm78_vm0, %v5076_v47 }
0x1307   :  { %4100 = vmatprep.mubr.msk.f32.mxu1 %vm78_vm0, %v5080_v48 }
0x130a   :  { %4101 = vmatmul.mubr.msk.f32.gmra.mxu1 %vm78_vm0, %v5084_v49 }
0x1372   :  { %v1716_v51 = vpop.permute.xlu1 %1715 }
0x1373   :  { %v5089_v52 = vadd.f32 %v1716_v51, %v1708_v50 }
0x1375   :  { %4381 = vtanh.f32 %v5089_v52 }
0x1382   :  { %v4382_v53 = vpop.eup %4381 }
0x1383   :  { %1721 = vrot.lane.b32.xlu1 %v4382_v53, %s4477_s29 }
0x13ba   :  { %v1900_v33 = vpop.f32.mrf.mxu1 }
0x13bb   :  { %v1904_v55 = vadd.f32 %v1900_v33, %v4687_v21 }
0x13bc   :  { %v4065_v56 = vpop.f32.mrf.mxu1 }
0x13bd   :  { %4383 = vtanh.f32 %v1904_v55  ;;  %v3589_v61 = vmul.f32 -1.442695, %v1904_v55 }
0x13bf   :  { %4385 = vpow2.f32 %v3589_v61 }
0x13c2   :  { %v5206_v53 = vpop.f32.mrf.mxu1 }
0x13c4   :  { %v2206_v56 = vpop.f32.mrf.mxu1 }
0x13ca   :  { %v4384_v58 = vpop.eup %4383 }
0x13cb   :  { %1938 = vrot.lane.b32.xlu0 %v4384_v58, %s4477_s29 }
0x13cc   :  { %v4386_v62 = vpop.eup %4385 }
0x13cd   :  { %v1932_v0 = vadd.f32 1.0, %v4386_v62  ;;  %v5213_v62 = vld [vmem:[%s5470_s10] ss:$0 sm:$0xff] }
0x13cf   :  { %4387 = vrcp.f32 %v1932_v0 }
0x13dc   :  { %v4388_v1 = vpop.eup %4387 }
0x13dd   :  { %v1936_v7 = vmul.f32 %v4388_v1, %v5042_v31  ;;  %v1974_v31 = vld [vmem:[#allocation3 + $0x18] sm:$0xff] }
0x13f5   :  { %v1722_v60 = vpop.permute.xlu1 %1721 }
0x13f6   :  { %v1724_v59 = vmul.f32 %v4380_v40, %v1722_v60 }
0x13f8   :  { %1750 = vrot.lane.b32.xlu1 %v1724_v59, %s4478_s2 }
0x143d   :  { %v1939_v3 = vpop.permute.xlu0 %1938 }
0x143e   :  { %v1941_v5 = vmul.f32 %v4388_v1, %v1939_v3 }
0x1440   :  { %1943 = vrot.lane.b32.xlu0 %v1941_v5, %s4478_s2 }
0x146a   :  { %v1751_v21 = vpop.permute.xlu1 %1750 }
0x146b   :  { %1753 = vst.msk [vmem:[#allocation2 + $0x30] sm:$0xff] %vm78_vm0, %v1751_v21  ;;  %4053 = vmatmul.mubr.msk.f32.vlgmr.msra.gmra.mxu0 %vm78_vm0, %v1751_v21 }
0x146c   :  { %4067 = vmatpush3.msra.mxu0 %v1986_v16 }
0x146d   :  { %4068 = vmatprep.subr.mxu0 %v1985_v17 }
0x146e   :  { %4069 = vmatpush3.msra.mxu0 %v1985_v17 }
0x146f   :  { %4070 = vmatprep.subr.mxu0 %v1984_v20 }
0x1470   :  { %4071 = vmatpush3.msra.mxu0 %v1984_v20 }
0x1472   :  { %v5099_v23 = vld [vmem:[#allocation2 + $0x30] sm:$0xff] }
0x1473   :  { %4103 = vmatprep.mubr.msk.f32.mxu1 %vm78_vm0, %v5099_v23 }
0x14b2   :  { %v1944_v10 = vpop.permute.xlu0 %1943 }
0x14b3   :  { %v1946_v11 = vadd.f32 %v1944_v10, %v1936_v7 }
0x14b5   :  { %4389 = vtanh.f32 %v1946_v11 }
0x14c2   :  { %v4390_v14 = vpop.eup %4389 }
0x14c3   :  { %1949 = vrot.lane.b32.xlu0 %v4390_v14, %s4477_s29 }
0x152b   :  { %v1827_v15 = vpop.f32.mrf.mxu0 }
0x152c   :  { %v5106_v54 = vadd.f32 %v1827_v15, %v4782_v2  ;;  %v1983_v2 = vld [vmem:[%s5467_s8] sm:$0xff] }
0x152d   :  { %v4054_v18 = vpop.f32.mrf.mxu0  ;;  %4072 = vmatprep.subr.mxu0 %v1983_v2 }
0x152e   :  { %4073 = vmatpush3.msra.mxu0 %v1983_v2 }
0x152f   :  { %4106 = vmatprep.subr.mxu0 %v2267_v24 }
0x1535   :  { %v1950_v22 = vpop.permute.xlu0 %1949 }
0x1536   :  { %v1952_v26 = vmul.f32 %v4388_v1, %v1950_v22 }
0x1538   :  { %1959 = vrot.lane.b32.xlu0 %v1952_v26, %s4478_s2 }
0x15aa   :  { %v1960_v29 = vpop.permute.xlu0 %1959 }
0x15ab   :  { %1962 = vst.msk [vmem:[#allocation3] sm:$0xff] %vm78_vm0, %v1960_v29 }
0x15b2   :  { %v1971_v63 = vld [vmem:[#allocation3] sm:$0xff] }
0x15b3   :  { %4074 = vmatprep.mubr.msk.f32.mxu0 %vm78_vm0, %v1971_v63 }
0x15b4   :  { %4075 = vmatmul.mubr.msk.f32.vlgmr.msra.gmra.mxu0 %vm78_vm0, %v1972_v28 }
0x15b5   :  { %4077 = vmatprep.mubr.msk.f32.mxu0 %vm78_vm0, %v1973_v30  ;;  %4107 = vmatpush3.msra.mxu0 %v2267_v24  ;;  %v3588_v24 = vmul.f32 -1.442695, %v5106_v54 }
0x15b6   :  { %4108 = vmatprep.subr.mxu0 %v2266_v19 }
0x15b7   :  { %4109 = vmatpush3.msra.mxu0 %v2266_v19 }
0x15b8   :  { %4078 = vmatmul.mubr.msk.f32.gmra.mxu0 %vm78_vm0, %v1974_v31  ;;  %4110 = vmatprep.subr.mxu0 %v2265_v6 }
0x15b9   :  { %4080 = vmatprep.mubr.msk.f32.mxu0 %vm78_vm0, %v1975_v43  ;;  %4111 = vmatpush3.msra.mxu0 %v2265_v6 }
0x15ba   :  { %4112 = vmatprep.subr.mxu0 %v2264_v41 }
0x15bb   :  { %4113 = vmatpush3.msra.mxu0 %v2264_v41 }
0x15bc   :  { %4081 = vmatmul.mubr.msk.f32.gmra.mxu0 %vm78_vm0, %v1976_v44  ;;  %4146 = vmatprep.subr.mxu0 %v4475_v8 }
0x15bd   :  { %4083 = vmatprep.mubr.msk.f32.mxu0 %vm78_vm0, %v1977_v32 }
0x15c0   :  { %4084 = vmatmul.mubr.msk.f32.gmra.mxu0 %vm78_vm0, %v1978_v9 }
0x15c1   :  { %4114 = vmatprep.mubr.msk.f32.mxu0 %vm78_vm0, %v1971_v63 }
0x15c4   :  { %4115 = vmatmul.mubr.msk.f32.vlgmr.msra.gmra.mxu0 %vm78_vm0, %v1972_v28 }
0x15c5   :  { %4117 = vmatprep.mubr.msk.f32.mxu0 %vm78_vm0, %v1973_v30  ;;  %4147 = vmatpush3.msra.mxu0 %v5147_v45 }
0x15c6   :  { %4148 = vmatprep.subr.mxu0 %v4475_v8 }
0x15c7   :  { %4149 = vmatpush3.msra.mxu0 %v5153_v34 }
0x15c8   :  { %4118 = vmatmul.mubr.msk.f32.gmra.mxu0 %vm78_vm0, %v1974_v31  ;;  %4150 = vmatprep.subr.mxu0 %v4475_v8 }
0x15c9   :  { %4120 = vmatprep.mubr.msk.f32.mxu0 %vm78_vm0, %v1975_v43  ;;  %4151 = vmatpush3.msra.mxu0 %v5161_v12 }
0x15ca   :  { %4152 = vmatprep.subr.mxu0 %v4475_v8 }
0x15cb   :  { %4153 = vmatpush3.msra.mxu0 %v5169_v35 }
0x15cc   :  { %4121 = vmatmul.mubr.msk.f32.gmra.mxu0 %vm78_vm0, %v1976_v44  ;;  %4168 = vmatprep.subr.mxu0 %v4475_v8 }
0x15cd   :  { %4123 = vmatprep.mubr.msk.f32.mxu0 %vm78_vm0, %v1977_v32  ;;  %v2262_v32 = vld [vmem:[%s5471_s11 + $0x10] sm:$0xff] }
0x15d0   :  { %4124 = vmatmul.mubr.msk.f32.gmra.mxu0 %vm78_vm0, %v1978_v9  ;;  %v2261_v9 = vld [vmem:[%s5471_s11 + $0x8] sm:$0xff] }
0x15d1   :  { %4154 = vmatprep.mubr.msk.f32.mxu0 %vm4476_vm1, %v4475_v8 }
0x15d4   :  { %4155 = vmatmul.mubr.f32.vlgmr.msra.gmra.mxu0 %v4475_v8 }
0x15d5   :  { %4169 = vmatpush3.msra.mxu0 %v5147_v45  ;;  %4176 = vmatprep.mubr.msk.f32.mxu0 %vm4476_vm1, %v4475_v8 }
0x15d6   :  { %4170 = vmatprep.subr.mxu0 %v4475_v8 }
0x15d7   :  { %4171 = vmatpush3.msra.mxu0 %v5153_v34 }
0x15d8   :  { %4172 = vmatprep.subr.mxu0 %v4475_v8 }
0x15d9   :  { %4173 = vmatpush3.msra.mxu0 %v5161_v12 }
0x15da   :  { %4174 = vmatprep.subr.mxu0 %v4475_v8 }
0x15db   :  { %4175 = vmatpush3.msra.mxu0 %v5169_v35 }
0x15dc   :  { %4190 = vmatprep.subr.mxu0 %v4475_v8 }
0x1674   :  { %v5192_v36 = vpop.f32.mrf.mxu0 }
0x1676   :  { %v2077_v13 = vpop.f32.mrf.mxu0 }
0x1677   :  { %v2207_v60 = vadd.f32 %v2206_v56, %v2077_v13  ;;  %v2260_v13 = vld [vmem:[%s5471_s11] sm:$0xff] }
0x1678   :  { %v5194_v37 = vpop.f32.mrf.mxu0 }
0x1679   :  { %v2252_v0 = vadd.f32 %v5213_v62, %v2207_v60 }
0x167a   :  { %v5196_v38 = vpop.f32.mrf.mxu0 }
0x167c   :  { %v5198_v39 = vpop.f32.mrf.mxu0 }
0x167e   :  { %v5200_v40 = vpop.f32.mrf.mxu0 }
0x1680   :  { %v5202_v27 = vpop.f32.mrf.mxu0 }
0x1682   :  { %v5204_v42 = vpop.f32.mrf.mxu0 }
0x1684   :  { %v4116_v46 = vpop.f32.mrf.mxu0 }
0x1686   :  { %v2334_v50 = vpop.f32.mrf.mxu0 }
0x1688   :  { %v4119_v51 = vpop.f32.mrf.mxu0 }
0x1689   :  { %v2212_v51 = vadd.f32 %v5206_v53, %v5192_v36  ;;  %v2479_v36 = vld [vmem:[%s5472_s13 + $0x18] sm:$0xff]  ;;  %v2478_v53 = vld [vmem:[%s5472_s13 + $0x10] sm:$0xff] }
0x168a   :  { %v2342_v33 = vpop.f32.mrf.mxu0 }
0x168b   :  { %v2253_v33 = vadd.f32 %v5213_v62, %v2212_v51 }
0x168c   :  { %v4122_v55 = vpop.f32.mrf.mxu0 }
0x168e   :  { %v2350_v58 = vpop.f32.mrf.mxu0 }
0x1690   :  { %v5208_v59 = vpop.f32.mrf.mxu0 }
0x1692   :  { %v2358_v61 = vpop.f32.mrf.mxu0 }
0x1694   :  { %v2546_v1 = vpop.f32.mrf.mxu0 }
0x1695   :  { %v2550_v3 = vadd.f32 %v2546_v1, %v2252_v0 }
0x1696   :  { %v4156_v5 = vpop.f32.mrf.mxu0 }
0x1697   :  { %4391 = vtanh.f32 %v2550_v3  ;;  %v3624_v7 = vmul.f32 -1.442695, %v2550_v3  ;;  %v5305_v3 = vpop.f32.mrf.mxu1 }
0x1699   :  { %4393 = vpow2.f32 %v3624_v7 }
0x16a4   :  { %v4392_v21 = vpop.eup %4391 }
0x16a5   :  { %2631 = vrot.lane.b32.xlu0 %v4392_v21, %s4477_s29 }
0x16a6   :  { %v4394_v10 = vpop.eup %4393 }
0x16a7   :  { %v2625_v11 = vadd.f32 1.0, %v4394_v10  ;;  %v2216_v10 = vpop.f32.mrf.mxu1 }
0x16a9   :  { %4395 = vrcp.f32 %v2625_v11  ;;  %v5308_v11 = vpop.f32.mrf.mxu1 }
0x16b6   :  { %v4396_v14 = vpop.eup %4395 }
0x16b7   :  { %v2629_v17 = vmul.f32 0.0, %v4396_v14 }
0x1717   :  { %v2632_v15 = vpop.permute.xlu0 %2631 }
0x1718   :  { %v2634_v16 = vmul.f32 %v4396_v14, %v2632_v15 }
0x171a   :  { %2636 = vrot.lane.b32.xlu1 %v2634_v16, %s4478_s2 }
0x178c   :  { %v2637_v18 = vpop.permute.xlu1 %2636 }
0x178d   :  { %v5218_v20 = vadd.f32 %v2637_v18, %v2629_v17 }
0x178f   :  { %4397 = vtanh.f32 %v5218_v20 }
0x1790   :  { %4399 = vtanh.f32 %v5106_v54 }
0x1791   :  { %4401 = vpow2.f32 %v3588_v24 }
0x179c   :  { %v4398_v2 = vpop.eup %4397 }
0x179d   :  { %2642 = vrot.lane.b32.xlu0 %v4398_v2, %s4477_s29  ;;  %v4400_v22 = vpop.eup %4399 }
0x179e   :  { %v4402_v26 = vpop.eup %4401 }
0x179f   :  { %v1908_v29 = vadd.f32 1.0, %v4402_v26 }
0x17a1   :  { %1914 = vrot.lane.b32.xlu0 %v4400_v22, %s4477_s29  ;;  %4403 = vrcp.f32 %v1908_v29 }
0x17ae   :  { %v4404_v19 = vpop.eup %4403 }
0x17af   :  { %v1912_v54 = vmul.f32 %v4404_v19, %v5089_v52  ;;  %v2263_v52 = vld [vmem:[%s5471_s11 + $0x18] sm:$0xff] }
0x17b0   :  { %4126 = vmatprep.subr.mxu1 %v2263_v52 }
0x17b1   :  { %4127 = vmatpush3.msra.mxu1 %v2263_v52 }
0x17b2   :  { %4128 = vmatprep.subr.mxu1 %v2262_v32 }
0x17b3   :  { %4129 = vmatpush3.msra.mxu1 %v2262_v32 }
0x17b4   :  { %4130 = vmatprep.subr.mxu1 %v2261_v9 }
0x17b5   :  { %4131 = vmatpush3.msra.mxu1 %v2261_v9 }
0x17b6   :  { %4132 = vmatprep.subr.mxu1 %v2260_v13 }
0x17b7   :  { %4133 = vmatpush3.msra.mxu1 %v2260_v13 }
0x17b8   :  { %4157 = vmatprep.subr.mxu1 %v4475_v8 }
0x180f   :  { %v2643_v63 = vpop.permute.xlu0 %2642 }
0x1810   :  { %v2645_v28 = vmul.f32 %v4396_v14, %v2643_v63  ;;  %v5310_v14 = vpop.f32.mrf.mxu1  ;;  %v3623_v63 = vld [vmem:[%s5473_s14] ss:$0 sm:$0xff] }
0x1812   :  { %2671 = vrot.lane.b32.xlu1 %v2645_v28, %s4478_s2 }
0x1813   :  { %v1915_v30 = vpop.permute.xlu0 %1914 }
0x1814   :  { %v1917_v6 = vmul.f32 %v4404_v19, %v1915_v30 }
0x1816   :  { %1919 = vrot.lane.b32.xlu0 %v1917_v6, %s4478_s2 }
0x1884   :  { %v2672_v31 = vpop.permute.xlu1 %2671 }
0x1885   :  { %4177 = vmatmul.mubr.msk.f32.vlgmr.msra.gmra.mxu0 %vm78_vm0, %v2672_v31 }
0x1886   :  { %4191 = vmatpush3.msra.mxu0 %v5147_v45  ;;  %4198 = vmatprep.mubr.msk.f32.mxu0 %vm4476_vm1, %v4475_v8 }
0x1887   :  { %4192 = vmatprep.subr.mxu0 %v4475_v8 }
0x1888   :  { %v1920_v41 = vpop.permute.xlu0 %1919  ;;  %4193 = vmatpush3.msra.mxu0 %v5153_v34 }
0x1889   :  { %v1922_v43 = vadd.f32 %v1920_v41, %v1912_v54  ;;  %4194 = vmatprep.subr.mxu0 %v4475_v8 }
0x188a   :  { %4195 = vmatpush3.msra.mxu0 %v5161_v12 }
0x188b   :  { %4405 = vtanh.f32 %v1922_v43  ;;  %4196 = vmatprep.subr.mxu0 %v4475_v8 }
0x188c   :  { %4197 = vmatpush3.msra.mxu0 %v5169_v35 }
0x188d   :  { %4212 = vmatprep.subr.mxu0 %v4475_v8 }
0x1898   :  { %v4406_v44 = vpop.eup %4405 }
0x1899   :  { %1925 = vrot.lane.b32.xlu0 %v4406_v44, %s4477_s29 }
0x190b   :  { %v1926_v46 = vpop.permute.xlu0 %1925 }
0x190c   :  { %v1928_v50 = vmul.f32 %v4404_v19, %v1926_v46 }
0x190e   :  { %1954 = vrot.lane.b32.xlu0 %v1928_v50, %s4478_s2 }
0x1945   :  { %v2741_v55 = vpop.f32.mrf.mxu0 }
0x1946   :  { %v2745_v56 = vadd.f32 %v2741_v55, %v2253_v33 }
0x1947   :  { %v4178_v58 = vpop.f32.mrf.mxu0 }
0x1948   :  { %4407 = vtanh.f32 %v2745_v56 }
0x1955   :  { %v4408_v60 = vpop.eup %4407 }
0x1956   :  { %2755 = vrot.lane.b32.xlu1 %v4408_v60, %s4477_s29 }
0x1980   :  { %v1955_v61 = vpop.permute.xlu0 %1954 }
0x1981   :  { %1957 = vst.msk [vmem:[#allocation2 + $0x38] sm:$0xff] %vm78_vm0, %v1955_v61 }
0x1988   :  { %v1970_v0 = vld [vmem:[#allocation2 + $0x38] sm:$0xff] }
0x1989   :  { %4104 = vmatmul.mubr.msk.f32.gmra.mxu1 %vm78_vm0, %v1970_v0 }
0x198a   :  { %4134 = vmatprep.mubr.msk.f32.mxu1 %vm78_vm0, %v5057_v4  ;;  %v2477_v4 = vld [vmem:[%s5472_s13 + $0x8] sm:$0xff] }
0x198d   :  { %4135 = vmatmul.mubr.msk.f32.vlgmr.msra.gmra.mxu1 %vm78_vm0, %v5068_v25  ;;  %v2476_v25 = vld [vmem:[%s5472_s13] sm:$0xff] }
0x198e   :  { %4137 = vmatprep.mubr.msk.f32.mxu1 %vm78_vm0, %v5072_v57  ;;  %4158 = vmatpush3.msra.mxu1 %v2479_v36  ;;  %v3627_v57 = vmul.f32 -1.442695, %v2745_v56 }
0x198f   :  { %4159 = vmatprep.subr.mxu1 %v4475_v8 }
0x1990   :  { %4160 = vmatpush3.msra.mxu1 %v2478_v53  ;;  %4409 = vpow2.f32 %v3627_v57 }
0x1991   :  { %4138 = vmatmul.mubr.msk.f32.gmra.mxu1 %vm78_vm0, %v5076_v47  ;;  %4161 = vmatprep.subr.mxu1 %v4475_v8 }
0x1992   :  { %4140 = vmatprep.mubr.msk.f32.mxu1 %vm78_vm0, %v5080_v48  ;;  %4162 = vmatpush3.msra.mxu1 %v2477_v4 }
0x1993   :  { %4163 = vmatprep.subr.mxu1 %v4475_v8 }
0x1994   :  { %4164 = vmatpush3.msra.mxu1 %v2476_v25  ;;  %v2222_v25 = vadd.f32 %v5305_v3, %v5194_v37 }
0x1995   :  { %4141 = vmatmul.mubr.msk.f32.gmra.mxu1 %vm78_vm0, %v5084_v49  ;;  %4179 = vmatprep.subr.mxu1 %v4475_v8 }
0x1996   :  { %4143 = vmatprep.mubr.msk.f32.mxu1 %vm78_vm0, %v5099_v23  ;;  %v2255_v57 = vadd.f32 %v5213_v62, %v2222_v25 }
0x1999   :  { %4144 = vmatmul.mubr.msk.f32.gmra.mxu1 %vm78_vm0, %v1970_v0 }
0x199a   :  { %4165 = vmatprep.mubr.msk.f32.mxu1 %vm4476_vm1, %v4475_v8 }
0x199d   :  { %4166 = vmatmul.mubr.f32.vlgmr.msra.gmra.mxu1 %v4475_v8  ;;  %v4410_v47 = vpop.eup %4409 }
0x199e   :  { %4180 = vmatpush3.msra.mxu1 %v5147_v45  ;;  %4187 = vmatprep.mubr.msk.f32.mxu1 %vm4476_vm1, %v4475_v8  ;;  %v2749_v48 = vadd.f32 1.0, %v4410_v47 }
0x199f   :  { %4181 = vmatprep.subr.mxu1 %v4475_v8 }
0x19a0   :  { %4182 = vmatpush3.msra.mxu1 %v5153_v34  ;;  %4411 = vrcp.f32 %v2749_v48 }
0x19a1   :  { %4183 = vmatprep.subr.mxu1 %v4475_v8 }
0x19a2   :  { %4184 = vmatpush3.msra.mxu1 %v5161_v12 }
0x19a3   :  { %4185 = vmatprep.subr.mxu1 %v4475_v8 }
0x19a4   :  { %4186 = vmatpush3.msra.mxu1 %v5169_v35 }
0x19a5   :  { %4201 = vmatprep.subr.mxu1 %v4475_v8 }
0x19ad   :  { %v4412_v49 = vpop.eup %4411 }
0x19ae   :  { %v2753_v5 = vmul.f32 %v4412_v49, %v5218_v20 }
0x19c8   :  { %v2756_v23 = vpop.permute.xlu1 %2755 }
0x19c9   :  { %v2758_v1 = vmul.f32 %v4412_v49, %v2756_v23 }
0x19cb   :  { %2760 = vrot.lane.b32.xlu1 %v2758_v1, %s4478_s2 }
0x1a3d   :  { %v2761_v21 = vpop.permute.xlu1 %2760 }
0x1a3e   :  { %v2763_v7 = vadd.f32 %v2761_v21, %v2753_v5 }
0x1a40   :  { %4413 = vtanh.f32 %v2763_v7 }
0x1a49   :  { %v5312_v15 = vpop.f32.mrf.mxu1 }
0x1a4b   :  { %v5314_v16 = vpop.f32.mrf.mxu1 }
0x1a4c   :  { %v2237_v25 = vadd.f32 %v5314_v16, %v5204_v42 }
0x1a4d   :  { %v4414_v17 = vpop.eup %4413  ;;  %v4136_v18 = vpop.f32.mrf.mxu1 }
0x1a4e   :  { %2766 = vrot.lane.b32.xlu1 %v4414_v17, %s4477_s29 }
0x1a4f   :  { %v2432_v2 = vpop.f32.mrf.mxu1 }
0x1a51   :  { %v4139_v22 = vpop.f32.mrf.mxu1 }
0x1a53   :  { %v2440_v24 = vpop.f32.mrf.mxu1 }
0x1a55   :  { %v4142_v20 = vpop.f32.mrf.mxu1 }
0x1a57   :  { %v2448_v26 = vpop.f32.mrf.mxu1 }
0x1a58   :  { %v2227_v26 = vadd.f32 %v5310_v14, %v5200_v40 }
0x1a59   :  { %v4145_v29 = vpop.f32.mrf.mxu1 }
0x1a5a   :  { %v2461_v28 = vadd.f32 %v4145_v29, %v5208_v59  ;;  %v2217_v59 = vadd.f32 %v2216_v10, %v5196_v38  ;;  %v2256_v29 = vadd.f32 %v5213_v62, %v2227_v26 }
0x1a5b   :  { %v2456_v19 = vpop.f32.mrf.mxu1 }
0x1a5c   :  { %v2471_v30 = vadd.f32 %v3623_v63, %v2461_v28  ;;  %v2254_v52 = vadd.f32 %v5213_v62, %v2217_v59 }
0x1a5d   :  { %v2617_v6 = vpop.f32.mrf.mxu1 }
0x1a5e   :  { %v5321_v31 = vadd.f32 %v2617_v6, %v2471_v30 }
0x1a5f   :  { %v4167_v54 = vpop.f32.mrf.mxu1 }
0x1ac0   :  { %v2767_v41 = vpop.permute.xlu1 %2766 }
0x1ac1   :  { %v2769_v43 = vmul.f32 %v4412_v49, %v2767_v41 }
0x1ac3   :  { %2771 = vrot.lane.b32.xlu1 %v2769_v43, %s4478_s2 }
0x1b35   :  { %v2772_v44 = vpop.permute.xlu1 %2771 }
0x1b36   :  { %4188 = vmatmul.mubr.msk.f32.vlgmr.msra.gmra.mxu1 %vm78_vm0, %v2772_v44 }
0x1b37   :  { %4202 = vmatpush3.msra.mxu1 %v5147_v45  ;;  %4209 = vmatprep.mubr.msk.f32.mxu1 %vm4476_vm1, %v4475_v8 }
0x1b38   :  { %4203 = vmatprep.subr.mxu1 %v4475_v8 }
0x1b39   :  { %4204 = vmatpush3.msra.mxu1 %v5153_v34 }
0x1b3a   :  { %4205 = vmatprep.subr.mxu1 %v4475_v8 }
0x1b3b   :  { %4206 = vmatpush3.msra.mxu1 %v5161_v12 }
0x1b3c   :  { %4207 = vmatprep.subr.mxu1 %v4475_v8 }
0x1b3d   :  { %4208 = vmatpush3.msra.mxu1 %v5169_v35 }
0x1b3e   :  { %4223 = vmatprep.subr.mxu1 %v4475_v8 }
0x1bf6   :  { %v2841_v32 = vpop.f32.mrf.mxu1 }
0x1bf7   :  { %v2845_v9 = vadd.f32 %v2841_v32, %v2254_v52 }
0x1bf8   :  { %v4189_v13 = vpop.f32.mrf.mxu1 }
0x1bf9   :  { %4415 = vtanh.f32 %v2845_v9  ;;  %v3629_v50 = vmul.f32 -1.442695, %v2845_v9 }
0x1bfb   :  { %4417 = vpow2.f32 %v3629_v50 }
0x1c06   :  { %v4416_v46 = vpop.eup %4415 }
0x1c07   :  { %2855 = vrot.lane.b32.xlu0 %v4416_v46, %s4477_s29 }
0x1c08   :  { %v4418_v51 = vpop.eup %4417 }
0x1c09   :  { %v2849_v33 = vadd.f32 1.0, %v4418_v51 }
0x1c0b   :  { %4419 = vrcp.f32 %v2849_v33 }
0x1c18   :  { %v4420_v55 = vpop.eup %4419 }
0x1c19   :  { %v2853_v38 = vmul.f32 %v4420_v55, %v2763_v7 }
0x1c79   :  { %v2856_v56 = vpop.permute.xlu0 %2855 }
0x1c7a   :  { %v2858_v58 = vmul.f32 %v4420_v55, %v2856_v56 }
0x1c7c   :  { %2860 = vrot.lane.b32.xlu1 %v2858_v58, %s4478_s2 }
0x1cee   :  { %v2861_v60 = vpop.permute.xlu1 %2860 }
0x1cef   :  { %v2863_v61 = vadd.f32 %v2861_v60, %v2853_v38 }
0x1cf1   :  { %4421 = vtanh.f32 %v2863_v61 }
0x1cfe   :  { %v4422_v0 = vpop.eup %4421 }
0x1cff   :  { %2866 = vrot.lane.b32.xlu0 %v4422_v0, %s4477_s29 }
0x1d71   :  { %v2867_v36 = vpop.permute.xlu0 %2866 }
0x1d72   :  { %v2869_v53 = vmul.f32 %v4420_v55, %v2867_v36 }
0x1d74   :  { %2871 = vrot.lane.b32.xlu1 %v2869_v53, %s4478_s2 }
0x1de6   :  { %v2872_v4 = vpop.permute.xlu1 %2871 }
0x1de7   :  { %4199 = vmatmul.mubr.msk.f32.vlgmr.msra.gmra.mxu0 %vm78_vm0, %v2872_v4 }
0x1de8   :  { %4213 = vmatpush3.msra.mxu0 %v5147_v45  ;;  %4220 = vmatprep.mubr.msk.f32.mxu0 %vm4476_vm1, %v4475_v8 }
0x1de9   :  { %4214 = vmatprep.subr.mxu0 %v4475_v8 }
0x1dea   :  { %4215 = vmatpush3.msra.mxu0 %v5153_v34 }
0x1deb   :  { %4216 = vmatprep.subr.mxu0 %v4475_v8 }
0x1dec   :  { %4217 = vmatpush3.msra.mxu0 %v5161_v12 }
0x1ded   :  { %4218 = vmatprep.subr.mxu0 %v4475_v8 }
0x1dee   :  { %4219 = vmatpush3.msra.mxu0 %v5169_v35 }
0x1def   :  { %4234 = vmatprep.subr.mxu0 %v4475_v8 }
0x1ea7   :  { %v2941_v47 = vpop.f32.mrf.mxu0 }
0x1ea8   :  { %v2945_v48 = vadd.f32 %v2941_v47, %v2255_v57  ;;  %v2258_v57 = vadd.f32 %v5213_v62, %v2237_v25  ;;  %v3642_v25 = vld [vmem:[%s5476_s17] ss:$0 sm:$0xff] }
0x1ea9   :  { %v4200_v49 = vpop.f32.mrf.mxu0 }
0x1eaa   :  { %4423 = vtanh.f32 %v2945_v48  ;;  %v3631_v1 = vmul.f32 -1.442695, %v2945_v48 }
0x1eac   :  { %4425 = vpow2.f32 %v3631_v1 }
0x1eb7   :  { %v4424_v23 = vpop.eup %4423 }
0x1eb8   :  { %2955 = vrot.lane.b32.xlu0 %v4424_v23, %s4477_s29 }
0x1eb9   :  { %v4426_v5 = vpop.eup %4425 }
0x1eba   :  { %v2949_v21 = vadd.f32 1.0, %v4426_v5 }
0x1ebc   :  { %4427 = vrcp.f32 %v2949_v21 }
0x1ec9   :  { %v4428_v7 = vpop.eup %4427 }
0x1eca   :  { %v2953_v37 = vmul.f32 %v4428_v7, %v2863_v61 }
0x1f2a   :  { %v2956_v10 = vpop.permute.xlu0 %2955 }
0x1f2b   :  { %v2958_v17 = vmul.f32 %v4428_v7, %v2956_v10 }
0x1f2d   :  { %2960 = vrot.lane.b32.xlu1 %v2958_v17, %s4478_s2 }
0x1f9f   :  { %v2961_v3 = vpop.permute.xlu1 %2960 }
0x1fa0   :  { %v2963_v18 = vadd.f32 %v2961_v3, %v2953_v37 }
0x1fa2   :  { %4429 = vtanh.f32 %v2963_v18 }
0x1faf   :  { %v4430_v2 = vpop.eup %4429 }
0x1fb0   :  { %2966 = vrot.lane.b32.xlu0 %v4430_v2, %s4477_s29  ;;  %v3625_v2 = vmul.f32 -1.442695, %v5321_v31 }
0x2022   :  { %v2967_v22 = vpop.permute.xlu0 %2966 }
0x2023   :  { %v2969_v24 = vmul.f32 %v4428_v7, %v2967_v22 }
0x2025   :  { %2971 = vrot.lane.b32.xlu1 %v2969_v24, %s4478_s2 }
0x2097   :  { %v2972_v20 = vpop.permute.xlu1 %2971 }
0x2098   :  { %4210 = vmatmul.mubr.msk.f32.vlgmr.msra.gmra.mxu1 %vm78_vm0, %v2972_v20 }
0x2099   :  { %4224 = vmatpush3.msra.mxu1 %v5147_v45  ;;  %4231 = vmatprep.mubr.msk.f32.mxu1 %vm4476_vm1, %v4475_v8 }
0x209a   :  { %4225 = vmatprep.subr.mxu1 %v4475_v8 }
0x209b   :  { %4226 = vmatpush3.msra.mxu1 %v5153_v34 }
0x209c   :  { %4227 = vmatprep.subr.mxu1 %v4475_v8 }
0x209d   :  { %4228 = vmatpush3.msra.mxu1 %v5161_v12 }
0x209e   :  { %4229 = vmatprep.subr.mxu1 %v4475_v8 }
0x209f   :  { %4230 = vmatpush3.msra.mxu1 %v5169_v35 }
0x20a0   :  { %4245 = vmatprep.subr.mxu1 %v4475_v8 }
0x2158   :  { %v3041_v63 = vpop.f32.mrf.mxu1 }
0x2159   :  { %v3045_v28 = vadd.f32 %v3041_v63, %v2256_v29 }
0x215a   :  { %v4211_v19 = vpop.f32.mrf.mxu1 }
0x215b   :  { %4431 = vtanh.f32 %v3045_v28  ;;  %v3633_v6 = vmul.f32 -1.442695, %v3045_v28 }
0x215d   :  { %4433 = vpow2.f32 %v3633_v6 }
0x2168   :  { %v4432_v30 = vpop.eup %4431 }
0x2169   :  { %3055 = vrot.lane.b32.xlu0 %v4432_v30, %s4477_s29 }
0x216a   :  { %v4434_v54 = vpop.eup %4433 }
0x216b   :  { %v3049_v41 = vadd.f32 1.0, %v4434_v54 }
0x216d   :  { %4435 = vrcp.f32 %v3049_v41  ;;  %v3377_v41 = vld [vmem:[%s5474_s16 + $0x18] sm:$0xff] }
0x217a   :  { %v4436_v43 = vpop.eup %4435 }
0x217b   :  { %v3053_v40 = vmul.f32 %v4436_v43, %v2963_v18 }
0x21db   :  { %v3056_v44 = vpop.permute.xlu0 %3055 }
0x21dc   :  { %v3058_v59 = vmul.f32 %v4436_v43, %v3056_v44  ;;  %v3375_v44 = vld [vmem:[%s5474_s16 + $0x8] sm:$0xff] }
0x21de   :  { %3060 = vrot.lane.b32.xlu1 %v3058_v59, %s4478_s2  ;;  %v3374_v59 = vld [vmem:[%s5474_s16] sm:$0xff] }
0x2250   :  { %v3061_v14 = vpop.permute.xlu1 %3060 }
0x2251   :  { %v3063_v52 = vadd.f32 %v3061_v14, %v3053_v40 }
0x2253   :  { %4437 = vtanh.f32 %v3063_v52 }
0x2260   :  { %v4438_v32 = vpop.eup %4437 }
0x2261   :  { %3066 = vrot.lane.b32.xlu0 %v4438_v32, %s4477_s29 }
0x22d3   :  { %v3067_v9 = vpop.permute.xlu0 %3066 }
0x22d4   :  { %v3069_v13 = vmul.f32 %v4436_v43, %v3067_v9  ;;  %v3376_v43 = vld [vmem:[%s5474_s16 + $0x10] sm:$0xff] }
0x22d6   :  { %3071 = vrot.lane.b32.xlu1 %v3069_v13, %s4478_s2 }
0x2348   :  { %v3072_v46 = vpop.permute.xlu1 %3071 }
0x2349   :  { %4221 = vmatmul.mubr.msk.f32.vlgmr.msra.gmra.mxu0 %vm78_vm0, %v3072_v46 }
0x234a   :  { %4235 = vmatpush3.msra.mxu0 %v5147_v45  ;;  %4242 = vmatprep.mubr.msk.f32.mxu0 %vm4476_vm1, %v4475_v8  ;;  %v2232_v45 = vadd.f32 %v5308_v11, %v5198_v39 }
0x234b   :  { %4236 = vmatprep.subr.mxu0 %v4475_v8 }
0x234c   :  { %4237 = vmatpush3.msra.mxu0 %v5153_v34  ;;  %v2257_v50 = vadd.f32 %v5213_v62, %v2232_v45 }
0x234d   :  { %4238 = vmatprep.subr.mxu0 %v4475_v8 }
0x234e   :  { %4239 = vmatpush3.msra.mxu0 %v5161_v12 }
0x234f   :  { %4240 = vmatprep.subr.mxu0 %v4475_v8 }
0x2350   :  { %4241 = vmatpush3.msra.mxu0 %v5169_v35 }
0x2351   :  { %4256 = vmatprep.subr.mxu0 %v4475_v8 }
0x2409   :  { %v3141_v51 = vpop.f32.mrf.mxu0 }
0x240a   :  { %v3145_v33 = vadd.f32 %v3141_v51, %v2257_v50 }
0x240b   :  { %v4222_v55 = vpop.f32.mrf.mxu0 }
0x240c   :  { %4439 = vtanh.f32 %v3145_v33  ;;  %v3635_v56 = vmul.f32 -1.442695, %v3145_v33 }
0x240e   :  { %4441 = vpow2.f32 %v3635_v56 }
0x2419   :  { %v4440_v34 = vpop.eup %4439 }
0x241a   :  { %3155 = vrot.lane.b32.xlu0 %v4440_v34, %s4477_s29 }
0x241b   :  { %v4442_v12 = vpop.eup %4441 }
0x241c   :  { %v3149_v58 = vadd.f32 1.0, %v4442_v12 }
0x241e   :  { %4443 = vrcp.f32 %v3149_v58 }
0x242b   :  { %v4444_v35 = vpop.eup %4443 }
0x242c   :  { %v3153_v39 = vmul.f32 %v4444_v35, %v3063_v52  ;;  %v2242_v52 = vadd.f32 %v5312_v15, %v5202_v27 }
0x242e   :  { %v2259_v32 = vadd.f32 %v5213_v62, %v2242_v52 }
0x248c   :  { %v3156_v38 = vpop.permute.xlu0 %3155 }
0x248d   :  { %v3158_v60 = vmul.f32 %v4444_v35, %v3156_v38  ;;  %v3373_v38 = vld [vmem:[%s5475_s15 + $0x18] sm:$0xff] }
0x248f   :  { %3160 = vrot.lane.b32.xlu1 %v3158_v60, %s4478_s2  ;;  %v3372_v60 = vld [vmem:[%s5475_s15 + $0x10] sm:$0xff] }
0x2501   :  { %v3161_v11 = vpop.permute.xlu1 %3160 }
0x2502   :  { %v3163_v61 = vadd.f32 %v3161_v11, %v3153_v39  ;;  %v3371_v39 = vld [vmem:[%s5475_s15 + $0x8] sm:$0xff]  ;;  %v3370_v11 = vld [vmem:[%s5475_s15] sm:$0xff] }
0x2504   :  { %4445 = vtanh.f32 %v3163_v61 }
0x2511   :  { %v4446_v0 = vpop.eup %4445 }
0x2512   :  { %3166 = vrot.lane.b32.xlu0 %v4446_v0, %s4477_s29 }
0x2584   :  { %v3167_v36 = vpop.permute.xlu0 %3166 }
0x2585   :  { %v3169_v53 = vmul.f32 %v4444_v35, %v3167_v36 }
0x2587   :  { %3171 = vrot.lane.b32.xlu1 %v3169_v53, %s4478_s2 }
0x25f9   :  { %v3172_v4 = vpop.permute.xlu1 %3171 }
0x25fa   :  { %4232 = vmatmul.mubr.msk.f32.vlgmr.msra.gmra.mxu1 %vm78_vm0, %v3172_v4 }
0x25fb   :  { %4253 = vmatprep.mubr.msk.f32.mxu1 %vm4476_vm1, %v4475_v8  ;;  %4246 = vmatpush3.msra.mxu1 %v3377_v41 }
0x25fc   :  { %4247 = vmatprep.subr.mxu1 %v4475_v8 }
0x25fd   :  { %4248 = vmatpush3.msra.mxu1 %v3376_v43 }
0x25fe   :  { %4249 = vmatprep.subr.mxu1 %v4475_v8 }
0x25ff   :  { %4250 = vmatpush3.msra.mxu1 %v3375_v44 }
0x2600   :  { %4251 = vmatprep.subr.mxu1 %v4475_v8 }
0x2601   :  { %4252 = vmatpush3.msra.mxu1 %v3374_v59 }
0x26ba   :  { %v3241_v47 = vpop.f32.mrf.mxu1 }
0x26bb   :  { %v3245_v48 = vadd.f32 %v3241_v47, %v2258_v57 }
0x26bc   :  { %v4233_v49 = vpop.f32.mrf.mxu1 }
0x26bd   :  { %4447 = vtanh.f32 %v3245_v48  ;;  %v3637_v1 = vmul.f32 -1.442695, %v3245_v48 }
0x26bf   :  { %4449 = vpow2.f32 %v3637_v1 }
0x26ca   :  { %v4448_v23 = vpop.eup %4447 }
0x26cb   :  { %3255 = vrot.lane.b32.xlu0 %v4448_v23, %s4477_s29 }
0x26cc   :  { %v4450_v5 = vpop.eup %4449 }
0x26cd   :  { %v3249_v21 = vadd.f32 1.0, %v4450_v5 }
0x26cf   :  { %4451 = vrcp.f32 %v3249_v21 }
0x26dc   :  { %v4452_v7 = vpop.eup %4451 }
0x26dd   :  { %v3253_v42 = vmul.f32 %v4452_v7, %v3163_v61 }
0x273d   :  { %v3256_v10 = vpop.permute.xlu0 %3255 }
0x273e   :  { %v3258_v17 = vmul.f32 %v4452_v7, %v3256_v10 }
0x2740   :  { %3260 = vrot.lane.b32.xlu1 %v3258_v17, %s4478_s2 }
0x27b2   :  { %v3261_v16 = vpop.permute.xlu1 %3260 }
0x27b3   :  { %v3263_v37 = vadd.f32 %v3261_v16, %v3253_v42 }
0x27b5   :  { %4453 = vtanh.f32 %v3263_v37 }
0x27b6   :  { %4455 = vtanh.f32 %v5321_v31 }
0x27b7   :  { %4457 = vpow2.f32 %v3625_v2 }
0x27c2   :  { %v4454_v3 = vpop.eup %4453 }
0x27c3   :  { %3266 = vrot.lane.b32.xlu0 %v4454_v3, %s4477_s29  ;;  %v4456_v18 = vpop.eup %4455 }
0x27c4   :  { %v4458_v22 = vpop.eup %4457 }
0x27c5   :  { %v2649_v24 = vadd.f32 1.0, %v4458_v22 }
0x27c7   :  { %2655 = vrot.lane.b32.xlu0 %v4456_v18, %s4477_s29  ;;  %4459 = vrcp.f32 %v2649_v24 }
0x27d4   :  { %v4460_v29 = vpop.eup %4459 }
0x27d5   :  { %v2653_v31 = vmul.f32 0.0, %v4460_v29 }
0x2835   :  { %v3267_v20 = vpop.permute.xlu0 %3266 }
0x2836   :  { %v3269_v26 = vmul.f32 %v4452_v7, %v3267_v20 }
0x2838   :  { %3271 = vrot.lane.b32.xlu1 %v3269_v26, %s4478_s2 }
0x2839   :  { %v2656_v63 = vpop.permute.xlu0 %2655 }
0x283a   :  { %v2658_v28 = vmul.f32 %v4460_v29, %v2656_v63 }
0x283c   :  { %2660 = vrot.lane.b32.xlu0 %v2658_v28, %s4478_s2 }
0x28aa   :  { %v3272_v19 = vpop.permute.xlu1 %3271 }
0x28ab   :  { %4243 = vmatmul.mubr.msk.f32.vlgmr.msra.gmra.mxu0 %vm78_vm0, %v3272_v19 }
0x28ac   :  { %4264 = vmatprep.mubr.msk.f32.mxu0 %vm4476_vm1, %v4475_v8  ;;  %4257 = vmatpush3.msra.mxu0 %v3373_v38 }
0x28ad   :  { %4258 = vmatprep.subr.mxu0 %v4475_v8 }
0x28ae   :  { %v2661_v30 = vpop.permute.xlu0 %2660  ;;  %4259 = vmatpush3.msra.mxu0 %v3372_v60 }
0x28af   :  { %v2663_v6 = vadd.f32 %v2661_v30, %v2653_v31  ;;  %4260 = vmatprep.subr.mxu0 %v4475_v8 }
0x28b0   :  { %4261 = vmatpush3.msra.mxu0 %v3371_v39 }
0x28b1   :  { %4461 = vtanh.f32 %v2663_v6  ;;  %4262 = vmatprep.subr.mxu0 %v4475_v8 }
0x28b2   :  { %4263 = vmatpush3.msra.mxu0 %v3370_v11 }
0x28be   :  { %v4462_v54 = vpop.eup %4461 }
0x28bf   :  { %2666 = vrot.lane.b32.xlu0 %v4462_v54, %s4477_s29 }
0x2931   :  { %v2667_v40 = vpop.permute.xlu0 %2666 }
0x2932   :  { %v2669_v14 = vmul.f32 %v4460_v29, %v2667_v40 }
0x2934   :  { %3379 = vrot.lane.b32.xlu0 %v2669_v14, %s4478_s2 }
0x296b   :  { %v3341_v9 = vpop.f32.mrf.mxu0 }
0x296c   :  { %v3345_v13 = vadd.f32 %v3341_v9, %v2259_v32 }
0x296d   :  { %v4244_v46 = vpop.f32.mrf.mxu0 }
0x296e   :  { %4463 = vtanh.f32 %v3345_v13  ;;  %v3639_v51 = vmul.f32 -1.442695, %v3345_v13 }
0x2970   :  { %4465 = vpow2.f32 %v3639_v51 }
0x297b   :  { %v4464_v45 = vpop.eup %4463 }
0x297c   :  { %3355 = vrot.lane.b32.xlu1 %v4464_v45, %s4477_s29 }
0x297d   :  { %v4466_v33 = vpop.eup %4465 }
0x297e   :  { %v3349_v55 = vadd.f32 1.0, %v4466_v33 }
0x2980   :  { %4467 = vrcp.f32 %v3349_v55 }
0x298d   :  { %v4468_v34 = vpop.eup %4467 }
0x298e   :  { %v3353_v62 = vmul.f32 %v4468_v34, %v3263_v37 }
0x29a6   :  { %v3380_v50 = vpop.permute.xlu0 %3379 }
0x29a7   :  { %4254 = vmatmul.mubr.msk.f32.vlgmr.msra.gmra.mxu1 %vm78_vm0, %v3380_v50 }
0x29ee   :  { %v3356_v56 = vpop.permute.xlu1 %3355 }
0x29ef   :  { %v3358_v27 = vmul.f32 %v4468_v34, %v3356_v56 }
0x29f1   :  { %3360 = vrot.lane.b32.xlu1 %v3358_v27, %s4478_s2 }
0x2a63   :  { %v3361_v15 = vpop.permute.xlu1 %3360 }
0x2a64   :  { %v3363_v12 = vadd.f32 %v3361_v15, %v3353_v62 }
0x2a66   :  { %4469 = vtanh.f32 %v3363_v12 }
0x2a67   :  { %v3449_v58 = vpop.f32.mrf.mxu1 }
0x2a69   :  { %v4255_v35 = vpop.f32.mrf.mxu1 }
0x2a73   :  { %v4470_v61 = vpop.eup %4469 }
0x2a74   :  { %3366 = vrot.lane.b32.xlu1 %v4470_v61, %s4477_s29 }
0x2ae6   :  { %v3367_v0 = vpop.permute.xlu1 %3366 }
0x2ae7   :  { %v3369_v36 = vmul.f32 %v4468_v34, %v3367_v0 }
0x2ae9   :  { %3454 = vrot.lane.b32.xlu1 %v3369_v36, %s4478_s2 }
0x2b5b   :  { %v3455_v53 = vpop.permute.xlu1 %3454 }
0x2b5c   :  { %4265 = vmatmul.mubr.msk.f32.vlgmr.msra.gmra.mxu0 %vm78_vm0, %v3455_v53 }
0x2c1c   :  { %v3524_v4 = vpop.f32.mrf.mxu0 }
0x2c1d   :  { %v3525_v57 = vadd.f32 %v3524_v4, %v3449_v58 }
0x2c1e   :  { %v4266_v47 = vpop.f32.mrf.mxu0 }
0x2c1f   :  { %v3535_v8 = vadd.f32 %v3642_v25, %v3525_v57 }
0x2c21   :  { %3537 = vst.msk [vmem:[%s5477_s18] sm:$0xff] %vm3536_vm2, %v3535_v8 }

</bundles_post_ra>
